<compile_context>
chip_gen: v5e
topology: v5e:2x2
jax: 0.10.0
libtpu: 0.0.40
codegen_flags: <defaults>
</compile_context>

<pallas_src>
import functools
import math

import jax
import jax.numpy as jnp
from jax import lax
from jax.experimental import pallas as pl
from jax.experimental.pallas import tpu as pltpu


def _gaussian_noise_kernel(seed_ref, x_ref, o_ref, *, sigma, tm, lw):
    half = tm // 2
    pid = pl.program_id(0)
    seed_u = seed_ref[0].astype(jnp.uint32)

    # Per-element global counter for the *half* tile we draw uniforms for.
    row = lax.broadcasted_iota(jnp.int32, (half, lw), 0).astype(jnp.uint32)
    col = lax.broadcasted_iota(jnp.int32, (half, lw), 1).astype(jnp.uint32)
    base = (pid * half).astype(jnp.uint32)
    ctr = (base + row) * jnp.uint32(lw) + col

    def mix(h):
        # splitmix32-style finalizer: good enough diffusion for noise injection.
        h = h ^ (h >> 16)
        h = h * jnp.uint32(0x7FEB352D)
        h = h ^ (h >> 15)
        h = h * jnp.uint32(0x846CA68B)
        h = h ^ (h >> 16)
        return h

    key = ctr ^ (seed_u * jnp.uint32(0x9E3779B9))
    bits1 = mix(key)
    bits2 = mix(bits1 + jnp.uint32(0x9E3779B9))

    # Mantissa bit-trick: uniform in [0, 1) without int->float converts.
    one_bits = jnp.uint32(0x3F800000)
    u1 = lax.bitcast_convert_type((bits1 >> 9) | one_bits, jnp.float32) - jnp.float32(1.0)
    u2 = lax.bitcast_convert_type((bits2 >> 9) | one_bits, jnp.float32) - jnp.float32(1.0)

    # Box-Muller, both branches, sigma folded into the radius.
    # (1 - u1) is in (0, 1], so the log is finite.
    r = jnp.sqrt(jnp.float32(-2.0) * jnp.log(jnp.float32(1.0) - u1)) * jnp.float32(sigma)
    theta = jnp.float32(2.0 * math.pi) * u2
    z = jnp.concatenate([r * jnp.cos(theta), r * jnp.sin(theta)], axis=0)  # (tm, lw)

    o_ref[...] = x_ref[...] + z.astype(x_ref.dtype)


def gaussian_noise(x, seed, sigma, training=True):
    """x: any shape (NCHW in the module). Returns x + N(0, sigma^2) when training."""
    if not training:
        return x

    orig_shape = x.shape
    total = x.size

    LW = 1024                                   # lane-dense last dim (multiple of 128)
    rows_raw = max(1, -(-total // LW))
    if rows_raw >= 256:
        TM = 256                                # 256*1024*4B = 1 MiB f32 tile
    else:
        TM = ((rows_raw + 7) // 8) * 8          # small inputs: one small tile, 8-aligned
    rows = ((rows_raw + TM - 1) // TM) * TM
    padded = rows * LW

    xf = x.reshape(-1)
    if padded != total:
        xf = jnp.pad(xf, (0, padded - total))
    x2 = xf.reshape(rows, LW)

    seed_arr = jnp.asarray([seed], dtype=jnp.int32)
    kernel = functools.partial(_gaussian_noise_kernel, sigma=float(sigma), tm=TM, lw=LW)

    out = pl.pallas_call(
        kernel,
        out_shape=jax.ShapeDtypeStruct(x2.shape, x2.dtype),
        grid_spec=pltpu.PrefetchScalarGridSpec(
            num_scalar_prefetch=1,
            grid=(rows // TM,),
            in_specs=[pl.BlockSpec((TM, LW), lambda i, seed: (i, 0))],
            out_specs=pl.BlockSpec((TM, LW), lambda i, seed: (i, 0)),
        ),
        compiler_params=pltpu.CompilerParams(
            dimension_semantics=("parallel",),
        ),
    )(seed_arr, x2)

    return out.reshape(-1)[:total].reshape(orig_shape)


if __name__ == "__main__":
    key = jax.random.PRNGKey(0)
    x = jax.random.normal(key, (2, 4, 16, 16), dtype=jnp.float32)

    sigma = 0.1
    y_train = gaussian_noise(x, seed=1234, sigma=sigma, training=True)
    y_train = jax.block_until_ready(y_train)

    # eval-mode path is identity (no kernel needed)
    y_eval = gaussian_noise(x, seed=1234, sigma=sigma, training=False)
    y_eval = jax.block_until_ready(y_eval)

    assert y_train.shape == x.shape and y_train.dtype == x.dtype
    assert bool(jnp.all(y_eval == x))
    # noise should be small (sigma = 0.1) but non-zero
    noise = y_train - x
    assert float(jnp.max(jnp.abs(noise))) > 0.0
    assert float(jnp.std(noise)) < 1.0

    print("KERNEL_OK")
</pallas_src>

<mosaic_0001>
module attributes {stable_mosaic.version = 11 : i64} {
  func.func @_gaussian_noise_kernel(%arg0: i32, %arg1: memref<1xi32, #tpu.memory_space<smem>>, %arg2: memref<8x1024xf32, #tpu.memory_space<vmem>>, %arg3: memref<8x1024xf32, #tpu.memory_space<vmem>>) attributes {dimension_semantics = [#tpu.dimension_semantics<parallel>], iteration_bounds = array<i64: 1>, scalar_prefetch = 1 : i64, scratch_operands = 0 : i64, tpu.core_type = #tpu.core_type<tc>, window_params = [{transform_indices = @transform_0, window_bounds = array<i64: 8, 1024>}, {transform_indices = @transform_1, window_bounds = array<i64: 8, 1024>}]} {
    %c0 = arith.constant 0 : index
    %0 = memref.load %arg1[%c0] : memref<1xi32, #tpu.memory_space<smem>>
    %1 = tpu.iota {dimensions = array<i32: 0>} : vector<4x1024xi32>
    %2 = tpu.iota {dimensions = array<i32: 1>} : vector<4x1024xi32>
    %c4_i32 = arith.constant 4 : i32
    %3 = arith.muli %arg0, %c4_i32 : i32
    %4 = vector.broadcast %3 : i32 to vector<4x1024xi32>
    %5 = arith.addi %4, %1 : vector<4x1024xi32>
    %c1024_i32 = arith.constant 1024 : i32
    %6 = vector.broadcast %c1024_i32 : i32 to vector<4x1024xi32>
    %7 = arith.muli %5, %6 : vector<4x1024xi32>
    %8 = arith.addi %7, %2 : vector<4x1024xi32>
    %c-1640531527_i32 = arith.constant -1640531527 : i32
    %9 = arith.muli %0, %c-1640531527_i32 : i32
    %10 = vector.broadcast %9 : i32 to vector<4x1024xi32>
    %11 = arith.xori %8, %10 : vector<4x1024xi32>
    %c16_i32 = arith.constant 16 : i32
    %12 = vector.broadcast %c16_i32 : i32 to vector<4x1024xi32>
    %13 = arith.shrui %11, %12 : vector<4x1024xi32>
    %14 = arith.xori %11, %13 : vector<4x1024xi32>
    %c2146121005_i32 = arith.constant 2146121005 : i32
    %15 = vector.broadcast %c2146121005_i32 : i32 to vector<4x1024xi32>
    %16 = arith.muli %14, %15 : vector<4x1024xi32>
    %c15_i32 = arith.constant 15 : i32
    %17 = vector.broadcast %c15_i32 : i32 to vector<4x1024xi32>
    %18 = arith.shrui %16, %17 : vector<4x1024xi32>
    %19 = arith.xori %16, %18 : vector<4x1024xi32>
    %c-2073254261_i32 = arith.constant -2073254261 : i32
    %20 = vector.broadcast %c-2073254261_i32 : i32 to vector<4x1024xi32>
    %21 = arith.muli %19, %20 : vector<4x1024xi32>
    %c16_i32_0 = arith.constant 16 : i32
    %22 = vector.broadcast %c16_i32_0 : i32 to vector<4x1024xi32>
    %23 = arith.shrui %21, %22 : vector<4x1024xi32>
    %24 = arith.xori %21, %23 : vector<4x1024xi32>
    %c-1640531527_i32_1 = arith.constant -1640531527 : i32
    %25 = vector.broadcast %c-1640531527_i32_1 : i32 to vector<4x1024xi32>
    %26 = arith.addi %24, %25 : vector<4x1024xi32>
    %c16_i32_2 = arith.constant 16 : i32
    %27 = vector.broadcast %c16_i32_2 : i32 to vector<4x1024xi32>
    %28 = arith.shrui %26, %27 : vector<4x1024xi32>
    %29 = arith.xori %26, %28 : vector<4x1024xi32>
    %c2146121005_i32_3 = arith.constant 2146121005 : i32
    %30 = vector.broadcast %c2146121005_i32_3 : i32 to vector<4x1024xi32>
    %31 = arith.muli %29, %30 : vector<4x1024xi32>
    %c15_i32_4 = arith.constant 15 : i32
    %32 = vector.broadcast %c15_i32_4 : i32 to vector<4x1024xi32>
    %33 = arith.shrui %31, %32 : vector<4x1024xi32>
    %34 = arith.xori %31, %33 : vector<4x1024xi32>
    %c-2073254261_i32_5 = arith.constant -2073254261 : i32
    %35 = vector.broadcast %c-2073254261_i32_5 : i32 to vector<4x1024xi32>
    %36 = arith.muli %34, %35 : vector<4x1024xi32>
    %c16_i32_6 = arith.constant 16 : i32
    %37 = vector.broadcast %c16_i32_6 : i32 to vector<4x1024xi32>
    %38 = arith.shrui %36, %37 : vector<4x1024xi32>
    %39 = arith.xori %36, %38 : vector<4x1024xi32>
    %c9_i32 = arith.constant 9 : i32
    %40 = vector.broadcast %c9_i32 : i32 to vector<4x1024xi32>
    %41 = arith.shrui %24, %40 : vector<4x1024xi32>
    %c1065353216_i32 = arith.constant 1065353216 : i32
    %42 = vector.broadcast %c1065353216_i32 : i32 to vector<4x1024xi32>
    %43 = arith.ori %41, %42 : vector<4x1024xi32>
    %44 = tpu.bitcast %43 : vector<4x1024xi32> -> vector<4x1024xf32>
    %cst = arith.constant 1.000000e+00 : f32
    %45 = vector.broadcast %cst : f32 to vector<4x1024xf32>
    %46 = arith.subf %44, %45 : vector<4x1024xf32>
    %c9_i32_7 = arith.constant 9 : i32
    %47 = vector.broadcast %c9_i32_7 : i32 to vector<4x1024xi32>
    %48 = arith.shrui %39, %47 : vector<4x1024xi32>
    %c1065353216_i32_8 = arith.constant 1065353216 : i32
    %49 = vector.broadcast %c1065353216_i32_8 : i32 to vector<4x1024xi32>
    %50 = arith.ori %48, %49 : vector<4x1024xi32>
    %51 = tpu.bitcast %50 : vector<4x1024xi32> -> vector<4x1024xf32>
    %cst_9 = arith.constant 1.000000e+00 : f32
    %52 = vector.broadcast %cst_9 : f32 to vector<4x1024xf32>
    %53 = arith.subf %51, %52 : vector<4x1024xf32>
    %cst_10 = arith.constant 1.000000e+00 : f32
    %54 = vector.broadcast %cst_10 : f32 to vector<4x1024xf32>
    %55 = arith.subf %54, %46 : vector<4x1024xf32>
    %56 = math.log %55 : vector<4x1024xf32>
    %cst_11 = arith.constant -2.000000e+00 : f32
    %57 = vector.broadcast %cst_11 : f32 to vector<4x1024xf32>
    %58 = arith.mulf %57, %56 : vector<4x1024xf32>
    %59 = math.sqrt %58 : vector<4x1024xf32>
    %cst_12 = arith.constant 1.000000e-01 : f32
    %60 = vector.broadcast %cst_12 : f32 to vector<4x1024xf32>
    %61 = arith.mulf %59, %60 : vector<4x1024xf32>
    %cst_13 = arith.constant 6.28318548 : f32
    %62 = vector.broadcast %cst_13 : f32 to vector<4x1024xf32>
    %63 = arith.mulf %62, %53 : vector<4x1024xf32>
    %64 = math.cos %63 : vector<4x1024xf32>
    %65 = arith.mulf %61, %64 : vector<4x1024xf32>
    %66 = math.sin %63 : vector<4x1024xf32>
    %67 = arith.mulf %61, %66 : vector<4x1024xf32>
    %68 = tpu.concatenate %65, %67 in 0 : vector<4x1024xf32>, vector<4x1024xf32> -> vector<8x1024xf32>
    %c0_14 = arith.constant 0 : index
    %c0_15 = arith.constant 0 : index
    %69 = vector.load %arg2[%c0_14, %c0_15] : memref<8x1024xf32, #tpu.memory_space<vmem>>, vector<8x1024xf32>
    %70 = arith.addf %69, %68 : vector<8x1024xf32>
    %c0_16 = arith.constant 0 : index
    %c0_17 = arith.constant 0 : index
    %71 = vector.load %arg3[%c0_16, %c0_17] : memref<8x1024xf32, #tpu.memory_space<vmem>>, vector<8x1024xf32>
    tpu.vector_store %arg3[%c0_16, %c0_17], %70 {strides = array<i32>} : memref<8x1024xf32, #tpu.memory_space<vmem>>, vector<8x1024xf32>,
    return
  }
  func.func @transform_0(%arg0: i32, %arg1: memref<1xi32, #tpu.memory_space<smem>>) -> (i32, i32) {
    %c0_i32 = arith.constant 0 : i32
    %c0_i32_0 = arith.constant 0 : i32
    return %arg0, %c0_i32 : i32, i32
  }
  func.func @transform_1(%arg0: i32, %arg1: memref<1xi32, #tpu.memory_space<smem>>) -> (i32, i32) {
    %c0_i32 = arith.constant 0 : i32
    %c0_i32_0 = arith.constant 0 : i32
    return %arg0, %c0_i32 : i32, i32
  }
}

</mosaic_0001>

<bundles_post_ra>
// kernel: tpu_custom_call.1
= control target key start
LH: loop header
LB: loop body
LE: loop exit
PB: predicated region body
PF: predicated region fallthrough
CT: control target
= control target key end

     0   :  { %8 = vsyncpa [#allocation5], 0  ;;  %s4748_s0 = inlined_call_operand.<no memory space> [shape: s32[1], index: 0, kind: input, shape index: {}]   ;;  %s4749_s1 = inlined_call_operand.hbm [shape: f32[8,1024], index: 1, kind: input, shape index: {}]   ;;  %s4750_s2 = inlined_call_operand.hbm [shape: f32[8,1024], index: 2, kind: output, shape index: {}]  }
   0x1   :  { %9 = vsyncpa [#allocation6], 0  ;;  %s15_s11 = sshll.u32 %s4749_s1, 4  ;;  %s3122_s12 = smov [#allocation4]   ;;  %s16_s11 = int_to_ptr.hbm [resolvable:$true] %s15_s11 }
   0x2   :  { %s17_s13 = sshll.u32 %s3122_s12, 4  ;;  %s18_s13 = int_to_ptr.vmem [resolvable:$true] %s17_s13 }
   0x3   :  { %20 = dma.hbm_to_vmem [thread:$0]  %s16_s11, 1024, %s18_s13, [#allocation5]  }
   0x4   :  { %3118 = dma.done.wait [#allocation5], 1024  }
   0x5   :  { %3119 = vsyncadd [#allocation5], 4294966272  ;;  %v26_v0 = vlaneseq  ;;  %s49_s16 = smul.u32 2654435769, %s4748_s0  ;;  %s3130_s0 = smov [#allocation7]  }
   0x6   :  { %s2953_s1 = sshll.u32 %s3130_s0, 4  ;;  %s2955_s19 = sshll.u32 %s4750_s2, 4  ;;  %s2954_s1 = int_to_ptr.vmem [resolvable:$true] %s2953_s1  ;;  %s2956_s19 = int_to_ptr.hbm [resolvable:$true] %s2955_s19 }
   0x7   :  { %v27_v1 = vshrl.u32 %v26_v0, 7  ;;  %v29_v2 = vand.u32 127, %v26_v0  ;;  %v50_v9 = vstv %s49_s16 }
   0x9   :  { %v30_v3 = vadd.s32 128, %v29_v2  ;;  %v31_v4 = vadd.s32 256, %v29_v2  ;;  %v32_v5 = vadd.s32 384, %v29_v2  ;;  %v33_v6 = vadd.s32 512, %v29_v2 }
   0xa   :  { %v40_v7 = vmul.u32 1024, %v27_v1  ;;  %v34_v8 = vadd.s32 640, %v29_v2  ;;  %v35_v10 = vadd.s32 768, %v29_v2  ;;  %v36_v11 = vadd.s32 896, %v29_v2 }
   0xc   :  { %v41_v12 = vadd.s32 %v40_v7, %v29_v2  ;;  %v42_v13 = vadd.s32 %v40_v7, %v30_v3  ;;  %v43_v14 = vadd.s32 %v40_v7, %v31_v4  ;;  %v44_v15 = vadd.s32 %v40_v7, %v32_v5 }
   0xd   :  { %v45_v16 = vadd.s32 %v40_v7, %v33_v6  ;;  %v46_v18 = vadd.s32 %v40_v7, %v34_v8  ;;  %v47_v19 = vadd.s32 %v40_v7, %v35_v10  ;;  %v48_v20 = vadd.s32 %v40_v7, %v36_v11 }
   0xe   :  { %v51_v17 = vxor.u32 %v50_v9, %v41_v12  ;;  %v52_v22 = vxor.u32 %v50_v9, %v42_v13  ;;  %v53_v23 = vxor.u32 %v50_v9, %v43_v14  ;;  %v54_v24 = vxor.u32 %v50_v9, %v44_v15 }
   0xf   :  { %v55_v25 = vxor.u32 %v50_v9, %v45_v16  ;;  %v56_v27 = vxor.u32 %v50_v9, %v46_v18  ;;  %v57_v28 = vxor.u32 %v50_v9, %v47_v19  ;;  %v58_v29 = vxor.u32 %v50_v9, %v48_v20 }
  0x10   :  { %v59_v21 = vshrl.u32 %v51_v17, 16  ;;  %v60_v31 = vshrl.u32 %v52_v22, 16  ;;  %v61_v32 = vshrl.u32 %v53_v23, 16  ;;  %v62_v33 = vshrl.u32 %v54_v24, 16 }
  0x11   :  { %v63_v34 = vshrl.u32 %v55_v25, 16  ;;  %v64_v36 = vshrl.u32 %v56_v27, 16  ;;  %v65_v37 = vshrl.u32 %v57_v28, 16  ;;  %v66_v38 = vshrl.u32 %v58_v29, 16 }
  0x12   :  { %v67_v26 = vxor.u32 %v59_v21, %v51_v17  ;;  %v68_v40 = vxor.u32 %v60_v31, %v52_v22  ;;  %v69_v41 = vxor.u32 %v61_v32, %v53_v23  ;;  %v70_v42 = vxor.u32 %v62_v33, %v54_v24 }
  0x13   :  { %v71_v43 = vxor.u32 %v63_v34, %v55_v25  ;;  %v72_v45 = vxor.u32 %v64_v36, %v56_v27  ;;  %v73_v46 = vxor.u32 %v65_v37, %v57_v28  ;;  %v74_v47 = vxor.u32 %v66_v38, %v58_v29 }
  0x14   :  { %v75_v30 = vmul.u32 2146121005, %v67_v26  ;;  %v76_v48 = vmul.u32 2146121005, %v68_v40  ;;  %v77_v50 = vmul.u32 2146121005, %v69_v41 }
  0x15   :  { %v78_v51 = vmul.u32 2146121005, %v70_v42  ;;  %v79_v52 = vmul.u32 2146121005, %v71_v43  ;;  %v80_v53 = vmul.u32 2146121005, %v72_v45 }
  0x16   :  { %v83_v35 = vshrl.u32 %v75_v30, 15  ;;  %v81_v55 = vmul.u32 2146121005, %v73_v46  ;;  %v82_v56 = vmul.u32 2146121005, %v74_v47  ;;  %v84_v57 = vshrl.u32 %v76_v48, 15 }
  0x17   :  { %v85_v59 = vshrl.u32 %v77_v50, 15  ;;  %v86_v60 = vshrl.u32 %v78_v51, 15  ;;  %v87_v61 = vshrl.u32 %v79_v52, 15  ;;  %v88_v62 = vshrl.u32 %v80_v53, 15 }
  0x18   :  { %v91_v39 = vxor.u32 %v83_v35, %v75_v30  ;;  %v89_v0 = vshrl.u32 %v81_v55, 15  ;;  %v90_v1 = vshrl.u32 %v82_v56, 15  ;;  %v92_v2 = vxor.u32 %v84_v57, %v76_v48 }
  0x19   :  { %v93_v3 = vxor.u32 %v85_v59, %v77_v50  ;;  %v94_v4 = vxor.u32 %v86_v60, %v78_v51  ;;  %v95_v5 = vxor.u32 %v87_v61, %v79_v52  ;;  %v96_v6 = vxor.u32 %v88_v62, %v80_v53 }
  0x1a   :  { %v99_v44 = vmul.u32 2221713035, %v91_v39  ;;  %v97_v8 = vxor.u32 %v89_v0, %v81_v55  ;;  %v98_v9 = vxor.u32 %v90_v1, %v82_v56  ;;  %v100_v10 = vmul.u32 2221713035, %v92_v2 }
  0x1b   :  { %v101_v11 = vmul.u32 2221713035, %v93_v3  ;;  %v102_v12 = vmul.u32 2221713035, %v94_v4  ;;  %v103_v13 = vmul.u32 2221713035, %v95_v5 }
  0x1c   :  { %v107_v49 = vshrl.u32 %v99_v44, 16  ;;  %v104_v14 = vmul.u32 2221713035, %v96_v6  ;;  %v105_v16 = vmul.u32 2221713035, %v97_v8  ;;  %v108_v18 = vshrl.u32 %v100_v10, 16 }
  0x1d   :  { %v106_v17 = vmul.u32 2221713035, %v98_v9  ;;  %v109_v19 = vshrl.u32 %v101_v11, 16  ;;  %v110_v20 = vshrl.u32 %v102_v12, 16  ;;  %v111_v21 = vshrl.u32 %v103_v13, 16 }
  0x1e   :  { %v3152_v54 = vxor.u32 %v107_v49, %v99_v44  ;;  %v112_v22 = vshrl.u32 %v104_v14, 16  ;;  %v113_v24 = vshrl.u32 %v105_v16, 16  ;;  %v3155_v26 = vxor.u32 %v108_v18, %v100_v10 }
  0x1f   :  { %v114_v25 = vshrl.u32 %v106_v17, 16  ;;  %v3157_v27 = vxor.u32 %v109_v19, %v101_v11  ;;  %v3159_v28 = vxor.u32 %v110_v20, %v102_v12  ;;  %v3161_v29 = vxor.u32 %v111_v21, %v103_v13 }
  0x20   :  { %v123_v58 = vadd.s32 2654435769, %v3152_v54  ;;  %v3163_v30 = vxor.u32 %v112_v22, %v104_v14  ;;  %v3165_v32 = vxor.u32 %v113_v24, %v105_v16  ;;  %v124_v34 = vadd.s32 2654435769, %v3155_v26 }
  0x21   :  { %v3167_v33 = vxor.u32 %v114_v25, %v106_v17  ;;  %v125_v35 = vadd.s32 2654435769, %v3157_v27  ;;  %v126_v36 = vadd.s32 2654435769, %v3159_v28  ;;  %v127_v37 = vadd.s32 2654435769, %v3161_v29 }
  0x22   :  { %v131_v63 = vshrl.u32 %v123_v58, 16  ;;  %v128_v38 = vadd.s32 2654435769, %v3163_v30  ;;  %v129_v40 = vadd.s32 2654435769, %v3165_v32  ;;  %v132_v42 = vshrl.u32 %v124_v34, 16 }
  0x23   :  { %v130_v41 = vadd.s32 2654435769, %v3167_v33  ;;  %v133_v43 = vshrl.u32 %v125_v35, 16  ;;  %v134_v44 = vshrl.u32 %v126_v36, 16  ;;  %v135_v45 = vshrl.u32 %v127_v37, 16 }
  0x24   :  { %v139_v7 = vxor.u32 %v131_v63, %v123_v58  ;;  %v136_v46 = vshrl.u32 %v128_v38, 16  ;;  %v137_v48 = vshrl.u32 %v129_v40, 16  ;;  %v140_v50 = vxor.u32 %v132_v42, %v124_v34 }
  0x25   :  { %v138_v49 = vshrl.u32 %v130_v41, 16  ;;  %v141_v51 = vxor.u32 %v133_v43, %v125_v35  ;;  %v142_v52 = vxor.u32 %v134_v44, %v126_v36  ;;  %v143_v53 = vxor.u32 %v135_v45, %v127_v37 }
  0x26   :  { %v147_v15 = vmul.u32 2146121005, %v139_v7  ;;  %v144_v55 = vxor.u32 %v136_v46, %v128_v38  ;;  %v145_v57 = vxor.u32 %v137_v48, %v129_v40  ;;  %v148_v59 = vmul.u32 2146121005, %v140_v50 }
  0x27   :  { %v146_v58 = vxor.u32 %v138_v49, %v130_v41  ;;  %v149_v60 = vmul.u32 2146121005, %v141_v51  ;;  %v150_v61 = vmul.u32 2146121005, %v142_v52  ;;  %v151_v62 = vmul.u32 2146121005, %v143_v53 }
  0x28   :  { %v155_v23 = vshrl.u32 %v147_v15, 15  ;;  %v152_v63 = vmul.u32 2146121005, %v144_v55  ;;  %v153_v1 = vmul.u32 2146121005, %v145_v57  ;;  %v156_v3 = vshrl.u32 %v148_v59, 15 }
  0x29   :  { %v154_v2 = vmul.u32 2146121005, %v146_v58  ;;  %v157_v4 = vshrl.u32 %v149_v60, 15  ;;  %v158_v5 = vshrl.u32 %v150_v61, 15  ;;  %v159_v6 = vshrl.u32 %v151_v62, 15 }
  0x2a   :  { %v163_v31 = vxor.u32 %v155_v23, %v147_v15  ;;  %v160_v7 = vshrl.u32 %v152_v63, 15  ;;  %v161_v9 = vshrl.u32 %v153_v1, 15  ;;  %v164_v11 = vxor.u32 %v156_v3, %v148_v59 }
  0x2b   :  { %v162_v10 = vshrl.u32 %v154_v2, 15  ;;  %v165_v12 = vxor.u32 %v157_v4, %v149_v60  ;;  %v166_v13 = vxor.u32 %v158_v5, %v150_v61  ;;  %v167_v14 = vxor.u32 %v159_v6, %v151_v62 }
  0x2c   :  { %v171_v39 = vmul.u32 2221713035, %v163_v31  ;;  %v168_v15 = vxor.u32 %v160_v7, %v152_v63  ;;  %v169_v17 = vxor.u32 %v161_v9, %v153_v1  ;;  %v172_v19 = vmul.u32 2221713035, %v164_v11 }
  0x2d   :  { %v170_v18 = vxor.u32 %v162_v10, %v154_v2  ;;  %v173_v20 = vmul.u32 2221713035, %v165_v12  ;;  %v174_v21 = vmul.u32 2221713035, %v166_v13  ;;  %v175_v22 = vmul.u32 2221713035, %v167_v14 }
  0x2e   :  { %v179_v47 = vshrl.u32 %v171_v39, 16  ;;  %v176_v23 = vmul.u32 2221713035, %v168_v15  ;;  %v177_v25 = vmul.u32 2221713035, %v169_v17  ;;  %v180_v34 = vshrl.u32 %v172_v19, 16 }
  0x2f   :  { %v178_v31 = vmul.u32 2221713035, %v170_v18  ;;  %v181_v35 = vshrl.u32 %v173_v20, 16  ;;  %v182_v36 = vshrl.u32 %v174_v21, 16  ;;  %v183_v37 = vshrl.u32 %v175_v22, 16 }
  0x30   :  { %v187_v56 = vxor.u32 %v179_v47, %v171_v39  ;;  %v184_v38 = vshrl.u32 %v176_v23, 16  ;;  %v195_v39 = vshrl.u32 %v3152_v54, 9  ;;  %v185_v41 = vshrl.u32 %v177_v25, 16 }
  0x31   :  { %v186_v42 = vshrl.u32 %v178_v31, 16  ;;  %v188_v43 = vxor.u32 %v180_v34, %v172_v19  ;;  %v196_v44 = vshrl.u32 %v3155_v26, 9  ;;  %v189_v45 = vxor.u32 %v181_v35, %v173_v20 }
  0x32   :  { %v227_v0 = vshrl.u32 %v187_v56, 9  ;;  %v190_v46 = vxor.u32 %v182_v36, %v174_v21  ;;  %v191_v47 = vxor.u32 %v183_v37, %v175_v22  ;;  %v197_v48 = vshrl.u32 %v3157_v27, 9 }
  0x33   :  { %v192_v49 = vxor.u32 %v184_v38, %v176_v23  ;;  %v198_v50 = vshrl.u32 %v3159_v28, 9  ;;  %v203_v51 = vor.u32 1065353216, %v195_v39  ;;  %v193_v53 = vxor.u32 %v185_v41, %v177_v25 }
  0x34   :  { %v235_v8 = vor.u32 1065353216, %v227_v0  ;;  %v194_v55 = vxor.u32 %v186_v42, %v178_v31  ;;  %v199_v54 = vshrl.u32 %v3161_v29, 9  ;;  %v200_v56 = vshrl.u32 %v3163_v30, 9 }
  0x35   :  { %v201_v57 = vshrl.u32 %v3165_v32, 9  ;;  %v202_v26 = vshrl.u32 %v3167_v33, 9  ;;  %v204_v58 = vor.u32 1065353216, %v196_v44  ;;  %v228_v59 = vshrl.u32 %v188_v43, 9 }
  0x36   :  { %v2973_v16 = vadd.f32 -1.0, %v235_v8  ;;  %v205_v60 = vor.u32 1065353216, %v197_v48  ;;  %v229_v61 = vshrl.u32 %v189_v45, 9  ;;  %v230_v27 = vshrl.u32 %v190_v46, 9 }
  0x37   :  { %v231_v62 = vshrl.u32 %v191_v47, 9  ;;  %v206_v63 = vor.u32 1065353216, %v198_v50  ;;  %v2965_v28 = vadd.f32 -1.0, %v203_v51  ;;  %v232_v0 = vshrl.u32 %v192_v49, 9 }
  0x38   :  { %v3176_v24 = vmul.f32 6.2831855, %v2973_v16  ;;  %v207_v2 = vor.u32 1065353216, %v199_v54  ;;  %v208_v3 = vor.u32 1065353216, %v200_v56  ;;  %v233_v4 = vshrl.u32 %v193_v53, 9 }
  0x39   :  { %v234_v29 = vshrl.u32 %v194_v55, 9  ;;  %v209_v5 = vor.u32 1065353216, %v201_v57  ;;  %v210_v30 = vor.u32 1065353216, %v202_v26  ;;  %v2966_v6 = vadd.f32 -1.0, %v204_v58 }
  0x3a   :  { %4808 = vst [vmem:[#allocation10_spill] sm:$0xff] %v3176_v24  ;;  %v406_v40 = vand.u32 2139095040, %v3176_v24  ;;  %v236_v32 = vor.u32 1065353216, %v228_v59  ;;  %v2967_v7 = vadd.f32 -1.0, %v205_v60  ;;  %v237_v33 = vor.u32 1065353216, %v229_v61 }
  0x3b   :  { %v238_v8 = vor.u32 1065353216, %v230_v27  ;;  %v239_v9 = vor.u32 1065353216, %v231_v62  ;;  %v2968_v10 = vadd.f32 -1.0, %v206_v63  ;;  %v240_v11 = vor.u32 1065353216, %v232_v0 }
  0x3c   :  { %v407_v52 = vshrl.u32 %v406_v40, 23  ;;  %v259_v12 = vsub.f32 1.0, %v2965_v28  ;;  %v2969_v14 = vadd.f32 -1.0, %v207_v2  ;;  %v2970_v15 = vadd.f32 -1.0, %v208_v3 }
  0x3d   :  { %v241_v16 = vor.u32 1065353216, %v233_v4  ;;  %v242_v17 = vor.u32 1065353216, %v234_v29  ;;  %v2971_v18 = vadd.f32 -1.0, %v209_v5  ;;  %v2972_v19 = vadd.f32 -1.0, %v210_v30 }
  0x3e   :  { %v2981_v1 = vadd.s32 4294967169, %v407_v52  ;;  %v2974_v20 = vadd.f32 -1.0, %v236_v32  ;;  %v260_v21 = vsub.f32 1.0, %v2966_v6  ;;  %v2975_v22 = vadd.f32 -1.0, %v237_v33 }
  0x3f   :  { %v2976_v23 = vadd.f32 -1.0, %v238_v8  ;;  %v2977_v25 = vadd.f32 -1.0, %v239_v9  ;;  %v261_v31 = vsub.f32 1.0, %v2967_v7  ;;  %v2978_v34 = vadd.f32 -1.0, %v240_v11 }
  0x40   :  { %v413_v13 = vadd.s32 1, %v2981_v1  ;;  %v262_v35 = vsub.f32 1.0, %v2968_v10  ;;  %3038 = vlog2.f32 %v259_v12  ;;  %v2979_v36 = vadd.f32 -1.0, %v241_v16 }
  0x41   :  { %v2980_v37 = vadd.f32 -1.0, %v242_v17  ;;  %v263_v38 = vsub.f32 1.0, %v2969_v14  ;;  %v4752_v39 = vand.u32 2147483647, %v3176_v24  ;;  %v264_v40 = vsub.f32 1.0, %v2970_v15 }
  0x42   :  { %vm414_vm0 = vcmp.gt.s32.totalorder %v413_v13, 0  ;;  %v265_v41 = vsub.f32 1.0, %v2971_v18  ;;  %v266_v42 = vsub.f32 1.0, %v2972_v19  ;;  %3040 = vlog2.f32 %v260_v21 }
  0x43   :  { %3042 = vlog2.f32 %v261_v31  ;;  %v3188_v43 = vmul.f32 6.2831855, %v2974_v20  ;;  %v3190_v44 = vmul.f32 6.2831855, %v2975_v22  ;;  %v415_v45 = vsel %vm414_vm0, %v413_v13, 0 }
  0x44   :  { %3044 = vlog2.f32 %v262_v35  ;;  %v3192_v46 = vmul.f32 6.2831855, %v2976_v23  ;;  %v3194_v47 = vmul.f32 6.2831855, %v2977_v25  ;;  %v3196_v48 = vmul.f32 6.2831855, %v2978_v34 }
  0x45   :  { %4809 = vst [vmem:[#allocation11_spill] sm:$0xff] %v3188_v43  ;;  %3046 = vlog2.f32 %v263_v38  ;;  %v3198_v49 = vmul.f32 6.2831855, %v2979_v36  ;;  %v410_v50 = vand.u32 8388607, %v4752_v39  ;;  %v417_v52 = vand.u32 31, %v415_v45 }
  0x46   :  { %4810 = vst [vmem:[#allocation12_spill] sm:$0xff] %v3190_v44  ;;  %v3039_v51 = vpop.eup %3038  ;;  %3048 = vlog2.f32 %v264_v40  ;;  %v3202_v53 = vmul.f32 6.2831855, %v2980_v37  ;;  %v3204_v54 = vshrl.u32 %v415_v45, 5  ;;  %v4764_v57 = vmov 683565275  }
  0x47   :  { %4811 = vst [vmem:[#allocation13_spill] sm:$0xff] %v3194_v47  ;;  %3050 = vlog2.f32 %v265_v41  ;;  %v3206_v56 = vsub.s32 32, %v417_v52  ;;  %v420_v26 = vshll.u32 %v4764_v57, %v417_v52  ;;  %v4762_v58 = vmov 2475754826  }
  0x48   :  { %4812 = vst [vmem:[#allocation14_spill] sm:$0xff] %v3196_v48  ;;  %v3041_v55 = vpop.eup %3040  ;;  %v423_v59 = vshll.u32 %v4762_v58, %v417_v52  ;;  %v268_v61 = vmul.f32 0.6931472, %v3039_v51  ;;  %3052 = vlog2.f32 %v266_v42  ;;  %v4760_v27 = vmov 2131351028  }
  0x49   :  { %4813 = vst [vmem:[#allocation15_spill] sm:$0xff] %v3198_v49  ;;  %v3043_v60 = vpop.eup %3042  ;;  %v426_v62 = vshll.u32 %v4760_v27, %v417_v52  ;;  %v4758_v63 = vmov 2102212464   ;;  %v411_v1 = vor.u32 8388608, %v410_v50  ;;  %v421_v2 = vshrl.u32 %v4762_v58, %v3206_v56 }
  0x4a   :  { %4814 = vst [vmem:[#allocation16_spill] sm:$0xff] %v3202_v53  ;;  %v429_v28 = vshll.u32 %v4758_v63, %v417_v52  ;;  %v3045_v0 = vpop.eup %3044  ;;  %v424_v3 = vshrl.u32 %v4760_v27, %v3206_v56  ;;  %v4756_v4 = vmov 920167782   ;;  %v270_v30 = vmul.f32 0.6931472, %v3041_v55 }
  0x4b   :  { %v432_v29 = vshll.u32 %v4756_v4, %v417_v52  ;;  %v3047_v5 = vpop.eup %3046  ;;  %v427_v6 = vshrl.u32 %v4758_v63, %v3206_v56  ;;  %v430_v32 = vshrl.u32 %v4756_v4, %v3206_v56  ;;  %v3223_v33 = vor.u32 %v421_v2, %v420_v26 }
  0x4c   :  { %v3221_v7 = vpop.eup %3048  ;;  %v3225_v8 = vor.u32 %v424_v3, %v423_v59  ;;  %v4753_v9 = vmov 1326507024   ;;  %vm435_vm1 = vcmp.lt.s32.totalorder %v3204_v54, 1  ;;  %vm437_vm2 = vcmp.lt.s32.totalorder %v3204_v54, 3 }
  0x4d   :  { %v433_v10 = vshrl.u32 %v4753_v9, %v3206_v56  ;;  %v3230_v11 = vpop.eup %3050  ;;  %v428_v12 = vor.u32 %v427_v6, %v426_v62  ;;  %v431_v13 = vor.u32 %v430_v32, %v429_v28  ;;  %v560_v14 = vand.u32 2139095040, %v3188_v43 }
  0x4e   :  { %vm436_vm3 = vcmp.lt.s32.totalorder %v3204_v54, 2  ;;  %vm438_vm4 = vcmp.lt.s32.totalorder %v3204_v54, 4  ;;  %v443_v16 = vsel %vm435_vm1, %v3223_v33, %v3225_v8  ;;  %v3240_v17 = vpop.eup %3052  ;;  %v272_v18 = vmul.f32 0.6931472, %v3043_v60 }
  0x4f   :  { %v434_v15 = vor.u32 %v433_v10, %v432_v29  ;;  %v444_v19 = vsel %vm438_vm4, %v431_v13, 920167782  ;;  %v447_v20 = vsel %vm435_vm1, %v3225_v8, %v428_v12  ;;  %v3247_v21 = vshll.u32 %v411_v1, 8 }
  0x50   :  { %v274_v22 = vmul.f32 0.6931472, %v3045_v0  ;;  %v3249_v23 = vmul.f32 -2.0, %v268_v61  ;;  %v445_v25 = vsel %vm437_vm2, %v428_v12, %v444_v19  ;;  %v3255_v34 = vmul.f32 -2.0, %v270_v30 }
  0x51   :  { %v448_v31 = vsel %vm438_vm4, %v434_v15, 1326507024  ;;  %v446_v35 = vsel %vm436_vm3, %v443_v16, %v445_v25  ;;  %v452_v37 = vand.u32 65535, %v3247_v21  ;;  %v453_v40 = vshrl.u32 %v3247_v21, 16 }
  0x52   :  { %v449_v36 = vsel %vm437_vm2, %v431_v13, %v448_v31  ;;  %v476_v41 = vand.u32 65535, %v446_v35  ;;  %v477_v42 = vshrl.u32 %v446_v35, 16  ;;  %v276_v45 = vmul.f32 0.6931472, %v3047_v5 }
  0x53   :  { %v450_v38 = vsel %vm436_vm3, %v447_v20, %v449_v36  ;;  %v561_v52 = vshrl.u32 %v560_v14, 23  ;;  %v3265_v55 = vmul.f32 -2.0, %v272_v18  ;;  %3054 = vrsqrt.f32 %v3249_v23 }
  0x54   :  { %v454_v50 = vand.u32 65535, %v450_v38  ;;  %v455_v51 = vshrl.u32 %v450_v38, 16  ;;  %v478_v26 = vmul.u32 %v476_v41, %v452_v37  ;;  %v479_v59 = vmul.u32 %v477_v42, %v452_v37 }
  0x55   :  { %v480_v60 = vmul.u32 %v476_v41, %v453_v40  ;;  %v481_v0 = vmul.u32 %v477_v42, %v453_v40  ;;  %v419_v3 = vshrl.u32 %v4764_v57, %v3206_v56  ;;  %v440_v6 = vsel %vm438_vm4, %v428_v12, 2102212464 }
  0x56   :  { %v456_v61 = vmul.u32 %v454_v50, %v452_v37  ;;  %v457_v62 = vmul.u32 %v455_v51, %v452_v37  ;;  %v458_v28 = vmul.u32 %v454_v50, %v453_v40  ;;  %v482_v1 = vshll.u32 %v479_v59, 16 }
  0x57   :  { %v484_v2 = vshll.u32 %v480_v60, 16  ;;  %v459_v29 = vmul.u32 %v455_v51, %v453_v40  ;;  %v2984_v10 = vadd.s32 4294967169, %v561_v52  ;;  %v4770_v14 = vmov 0  }
  0x58   :  { %v460_v5 = vshll.u32 %v457_v62, 16  ;;  %v462_v30 = vshll.u32 %v458_v28, 16  ;;  %vm486_vm5 = vc.u32 %v478_v26, %v482_v1  ;;  %v488_v32 = vadd.s32 %v482_v1, %v478_v26 }
  0x59   :  { %v487_v15 = vsel %vm486_vm5, 1, %v4770_v14  ;;  %v4751_v16 = vand.u32 2147483647, %v3188_v43  ;;  %v483_v19 = vshrl.u32 %v479_v59, 16  ;;  %v3275_v20 = vpop.eup %3054  ;;  %v461_v25 = vshrl.u32 %v457_v62, 16 }
  0x5a   :  { %vm464_vm6 = vc.u32 %v456_v61, %v460_v5  ;;  %v466_v13 = vadd.s32 %v460_v5, %v456_v61  ;;  %v489_v56 = vadd.s32 %v487_v15, %v481_v0  ;;  %vm490_vm7 = vc.u32 %v488_v32, %v484_v2 }
  0x5b   :  { %v465_v18 = vsel %vm464_vm6, 1, %v4770_v14  ;;  %v491_v12 = vsel %vm490_vm7, 1, %v4770_v14  ;;  %v485_v36 = vshrl.u32 %v480_v60, 16  ;;  %v567_v38 = vadd.s32 1, %v2984_v10 }
  0x5c   :  { %v467_v31 = vadd.s32 %v465_v18, %v459_v29  ;;  %vm468_vm8 = vc.u32 %v466_v13, %v462_v30  ;;  %v493_v37 = vadd.s32 %v491_v12, %v489_v56  ;;  %v278_v40 = vmul.f32 0.6931472, %v3221_v7 }
  0x5d   :  { %v469_v35 = vsel %vm468_vm8, 1, %v4770_v14  ;;  %v3280_v41 = vmul.f32 -2.0, %v274_v22  ;;  %v463_v42 = vshrl.u32 %v458_v28, 16  ;;  %v439_v51 = vsel %vm435_vm1, %v419_v3, %v3223_v33 }
  0x5e   :  { %v471_v50 = vadd.s32 %v469_v35, %v467_v31  ;;  %v441_v52 = vsel %vm437_vm2, %v3225_v8, %v440_v6  ;;  %v494_v26 = vadd.s32 %v493_v37, %v483_v19  ;;  %vm568_vm9 = vcmp.gt.s32.totalorder %v567_v38, 0 }
  0x5f   :  { %v564_v7 = vand.u32 8388607, %v4751_v16  ;;  %v569_v22 = vsel %vm568_vm9, %v567_v38, 0  ;;  %v280_v61 = vmul.f32 0.6931472, %v3230_v11  ;;  %v3292_v62 = vmul.f32 -2.0, %v276_v45 }
  0x60   :  { %v472_v60 = vadd.s32 %v471_v50, %v461_v25  ;;  %v495_v28 = vadd.s32 %v494_v26, %v485_v36  ;;  %v571_v0 = vand.u32 31, %v569_v22  ;;  %3056 = vrsqrt.f32 %v3255_v34 }
  0x61   :  { %v442_v33 = vsel %vm436_vm3, %v439_v51, %v441_v52  ;;  %v3299_v1 = vadd.s32 %v488_v32, %v484_v2  ;;  %v3301_v3 = vshrl.u32 %v569_v22, 5  ;;  %v282_v45 = vmul.f32 0.6931472, %v3240_v17 }
  0x62   :  { %v3297_v8 = vadd.s32 %v472_v60, %v463_v42  ;;  %v3303_v29 = vsub.s32 32, %v571_v0  ;;  %v574_v5 = vshll.u32 %v4764_v57, %v571_v0  ;;  %v577_v11 = vshll.u32 %v4762_v58, %v571_v0 }
  0x63   :  { %v565_v30 = vor.u32 8388608, %v564_v7  ;;  %v580_v6 = vshll.u32 %v4760_v27, %v571_v0  ;;  %v583_v54 = vshll.u32 %v4758_v63, %v571_v0  ;;  %v496_v10 = vmul.u32 %v3247_v21, %v442_v33 }
  0x64   :  { %v499_v13 = vadd.s32 1, %v495_v28  ;;  %v575_v2 = vshrl.u32 %v4762_v58, %v3303_v29  ;;  %v578_v32 = vshrl.u32 %v4760_v27, %v3303_v29  ;;  %vm498_vm10 = vc.u32 %v3297_v8, %v3299_v1 }
  0x65   :  { %v581_v17 = vshrl.u32 %v4758_v63, %v3303_v29  ;;  %v584_v15 = vshrl.u32 %v4756_v4, %v3303_v29  ;;  %v586_v18 = vshll.u32 %v4756_v4, %v571_v0  ;;  %v587_v56 = vshrl.u32 %v4753_v9, %v3303_v29 }
  0x66   :  { %v3322_v19 = vor.u32 %v575_v2, %v574_v5  ;;  %v3324_v21 = vor.u32 %v578_v32, %v577_v11  ;;  %vm589_vm11 = vcmp.lt.s32.totalorder %v3301_v3, 1  ;;  %v3329_v25 = vpop.eup %3056  ;;  %v3333_v35 = vshll.u32 %v565_v30, 8 }
  0x67   :  { %v3331_v31 = vor.u32 %v581_v17, %v580_v6  ;;  %v585_v12 = vor.u32 %v584_v15, %v583_v54  ;;  %v714_v36 = vand.u32 2139095040, %v3190_v44  ;;  %v588_v37 = vor.u32 %v587_v56, %v586_v18 }
  0x68   :  { %vm590_vm12 = vcmp.lt.s32.totalorder %v3301_v3, 2  ;;  %vm591_vm13 = vcmp.lt.s32.totalorder %v3301_v3, 3  ;;  %vm592_vm14 = vcmp.lt.s32.totalorder %v3301_v3, 4  ;;  %v3339_v38 = vmul.f32 -2.0, %v278_v40 }
  0x69   :  { %v500_v42 = vsel %vm498_vm10, %v499_v13, %v495_v28  ;;  %v597_v50 = vsel %vm589_vm11, %v3322_v19, %v3324_v21  ;;  %v598_v51 = vsel %vm592_vm14, %v585_v12, 920167782  ;;  %v601_v40 = vsel %vm589_vm11, %v3324_v21, %v3331_v31 }
  0x6a   :  { %v599_v26 = vsel %vm591_vm13, %v3331_v31, %v598_v51  ;;  %v602_v60 = vsel %vm592_vm14, %v588_v37, 1326507024  ;;  %v3360_v7 = vmul.f32 -2.0, %v280_v61  ;;  %3058 = vrsqrt.f32 %v3265_v55 }
  0x6b   :  { %v600_v22 = vsel %vm590_vm12, %v597_v50, %v599_v26  ;;  %v715_v28 = vshrl.u32 %v714_v36, 23  ;;  %v3365_v0 = vadd.s32 %v500_v42, %v496_v10  ;;  %v603_v33 = vsel %vm591_vm13, %v585_v12, %v602_v60 }
  0x6c   :  { %v606_v5 = vand.u32 65535, %v3333_v35  ;;  %v607_v11 = vshrl.u32 %v3333_v35, 16  ;;  %v3371_v30 = vmul.f32 -2.0, %v282_v45  ;;  %v604_v61 = vsel %vm590_vm12, %v601_v40, %v603_v33 }
  0x6d   :  { %v630_v6 = vand.u32 65535, %v600_v22  ;;  %v631_v54 = vshrl.u32 %v600_v22, 16  ;;  %3060 = vrsqrt.f32 %v3280_v41  ;;  %v608_v10 = vand.u32 65535, %v604_v61 }
  0x6e   :  { %v609_v2 = vshrl.u32 %v604_v61, 16  ;;  %v292_v32 = vmul.f32 %v3275_v20, %v3249_v23  ;;  %3062 = vrsqrt.f32 %v3292_v62  ;;  %v2987_v45 = vadd.s32 4294967169, %v715_v28 }
  0x6f   :  { %v502_v15 = vadd.s32 536870912, %v3365_v0  ;;  %v610_v18 = vmul.u32 %v608_v10, %v606_v5  ;;  %v612_v12 = vmul.u32 %v608_v10, %v607_v11  ;;  %v632_v42 = vmul.u32 %v630_v6, %v606_v5 }
  0x70   :  { %v611_v56 = vmul.u32 %v609_v2, %v606_v5  ;;  %v3382_v36 = vpop.eup %3058  ;;  %v633_v50 = vmul.u32 %v631_v54, %v606_v5  ;;  %v634_v51 = vmul.u32 %v630_v6, %v607_v11  ;;  %3064 = vrsqrt.f32 %v3339_v38 }
  0x71   :  { %v613_v40 = vmul.u32 %v609_v2, %v607_v11  ;;  %v293_v22 = vmul.f32 %v3275_v20, %v292_v32  ;;  %v616_v28 = vshll.u32 %v612_v12, 16  ;;  %v3390_v10 = vshrl.u32 %v502_v15, 30 }
  0x72   :  { %v614_v60 = vshll.u32 %v611_v56, 16  ;;  %v636_v33 = vshll.u32 %v633_v50, 16  ;;  %v638_v61 = vshll.u32 %v634_v51, 16  ;;  %v721_v17 = vadd.s32 1, %v2987_v45 }
  0x73   :  { %v3388_v16 = vpop.eup %3060  ;;  %v635_v39 = vmul.u32 %v631_v54, %v607_v11  ;;  %v304_v32 = vmul.f32 %v3329_v25, %v3255_v34  ;;  %3066 = vrsqrt.f32 %v3360_v7  ;;  %v573_v26 = vshrl.u32 %v4764_v57, %v3303_v29 }
  0x74   :  { %vm618_vm15 = vc.u32 %v610_v18, %v614_v60  ;;  %v620_v37 = vadd.s32 %v614_v60, %v610_v18  ;;  %v3392_v5 = vpop.eup %3062  ;;  %vm640_vm0 = vc.u32 %v632_v42, %v636_v33  ;;  %v642_v2 = vadd.s32 %v636_v33, %v632_v42 }
  0x75   :  { %v619_v6 = vsel %vm618_vm15, 1, %v4770_v14  ;;  %v594_v45 = vsel %vm592_vm14, %v3331_v31, 2102212464  ;;  %v641_v18 = vsel %vm640_vm0, 1, %v4770_v14  ;;  %v3406_v54 = vmul.f32 0.5, %v293_v22 }
  0x76   :  { %v621_v15 = vadd.s32 %v619_v6, %v613_v40  ;;  %vm622_vm1 = vc.u32 %v620_v37, %v616_v28  ;;  %vm644_vm2 = vc.u32 %v642_v2, %v638_v61  ;;  %v3404_v11 = vpop.eup %3064  ;;  %v504_v42 = vshll.u32 %v3390_v10, 30 }
  0x77   :  { %v615_v60 = vshrl.u32 %v611_v56, 16  ;;  %vm722_vm3 = vcmp.gt.s32.totalorder %v721_v17, 0  ;;  %v623_v33 = vsel %vm622_vm1, 1, %v4770_v14  ;;  %v637_v29 = vshrl.u32 %v633_v50, 16 }
  0x78   :  { %v643_v40 = vadd.s32 %v641_v18, %v635_v39  ;;  %v645_v6 = vsel %vm644_vm2, 1, %v4770_v14  ;;  %v593_v31 = vsel %vm589_vm11, %v573_v26, %v3322_v19  ;;  %v595_v37 = vsel %vm591_vm13, %v3324_v21, %v594_v45 }
  0x79   :  { %v617_v22 = vshrl.u32 %v612_v12, 16  ;;  %v625_v28 = vadd.s32 %v623_v33, %v621_v15  ;;  %v305_v13 = vmul.f32 %v3329_v25, %v304_v32  ;;  %v639_v56 = vshrl.u32 %v634_v51, 16  ;;  %v3418_v9 = vpop.eup %3066 }
  0x7a   :  { %v647_v52 = vadd.s32 %v645_v6, %v643_v40  ;;  %v723_v59 = vsel %vm722_vm3, %v721_v17, 0  ;;  %v316_v39 = vmul.f32 %v3382_v36, %v3265_v55  ;;  %v3422_v18 = vadd.s32 %v642_v2, %v638_v61 }
  0x7b   :  { %v626_v50 = vadd.s32 %v625_v28, %v615_v60  ;;  %v4755_v19 = vand.u32 2147483647, %v3190_v44  ;;  %v3426_v26 = vsub.s32 %v3365_v0, %v504_v42  ;;  %v596_v21 = vsel %vm590_vm12, %v593_v31, %v595_v37 }
  0x7c   :  { %v648_v12 = vadd.s32 %v647_v52, %v637_v29  ;;  %v725_v51 = vand.u32 31, %v723_v59  ;;  %3068 = vrsqrt.f32 %v3371_v30  ;;  %v295_v61 = vsub.f32 1.5, %v3406_v54 }
  0x7d   :  { %v3433_v15 = vadd.s32 %v626_v50, %v617_v22  ;;  %v328_v2 = vmul.f32 %v3388_v16, %v3280_v41  ;;  %v306_v3 = vmul.f32 0.5, %v305_v13  ;;  %v317_v52 = vmul.f32 %v3382_v36, %v316_v39 }
  0x7e   :  { %v649_v0 = vadd.s32 %v648_v12, %v639_v56  ;;  %v3438_v45 = vsub.s32 32, %v725_v51  ;;  %v650_v42 = vmul.u32 %v3333_v35, %v596_v21  ;;  %v507_v60 = vsub.s32 0, %v3426_v26 }
  0x7f   :  { %vm652_vm4 = vc.u32 %v3433_v15, %v3422_v18  ;;  %v718_v54 = vand.u32 8388607, %v4755_v19  ;;  %v3447_v29 = vshrl.u32 %v723_v59, 5  ;;  %v731_v40 = vshll.u32 %v4762_v58, %v725_v51 }
  0x80   :  { %v653_v33 = vadd.s32 1, %v649_v0  ;;  %v732_v13 = vshrl.u32 %v4760_v27, %v3438_v45  ;;  %v734_v6 = vshll.u32 %v4760_v27, %v725_v51  ;;  %v735_v35 = vshrl.u32 %v4758_v63, %v3438_v45 }
  0x81   :  { %v737_v37 = vshll.u32 %v4758_v63, %v725_v51  ;;  %v738_v22 = vshrl.u32 %v4756_v4, %v3438_v45  ;;  %v740_v28 = vshll.u32 %v4756_v4, %v725_v51  ;;  %v329_v56 = vmul.f32 %v3388_v16, %v328_v2 }
  0x82   :  { %v654_v31 = vsel %vm652_vm4, %v653_v33, %v649_v0  ;;  %v3459_v59 = vpop.eup %3068  ;;  %v340_v39 = vmul.f32 %v3392_v5, %v3292_v62  ;;  %vm506_vm5 = vcmp.lt.s32.totalorder %v3426_v26, 0  ;;  %vm298_vm6 = vcmp.eq.f32.partialorder %v3249_v23, inf }
  0x83   :  { %v655_v50 = vadd.s32 %v654_v31, %v650_v42  ;;  %v719_v21 = vor.u32 8388608, %v718_v54  ;;  %v728_v12 = vshll.u32 %v4764_v57, %v725_v51  ;;  %v729_v0 = vshrl.u32 %v4762_v58, %v3438_v45 }
  0x84   :  { %v4815_v33 = vmov 1326507024   ;;  %v3471_v17 = vor.u32 %v732_v13, %v731_v40  ;;  %v3473_v2 = vor.u32 %v735_v35, %v734_v6  ;;  %vm746_vm7 = vcmp.lt.s32.totalorder %v3447_v29, 4 }
  0x85   :  { %v741_v32 = vshrl.u32 %v4815_v33, %v3438_v45  ;;  %v656_v19 = vadd.s32 536870912, %v655_v50  ;;  %v508_v42 = vsel %vm506_vm5, %v507_v60, %v3426_v26  ;;  %v739_v31 = vor.u32 %v738_v22, %v737_v37 }
  0x86   :  { %vm743_vm8 = vcmp.lt.s32.totalorder %v3447_v29, 1  ;;  %v296_v51 = vmul.f32 %v3275_v20, %v295_v61  ;;  %vm300_vm9 = vcmp.eq.f32.partialorder %v3249_v23, 0.0  ;;  %v352_v54 = vmul.f32 %v3404_v11, %v3339_v38 }
  0x87   :  { %v742_v4 = vor.u32 %v741_v32, %v740_v28  ;;  %v3482_v63 = vshrl.u32 %v656_v19, 30  ;;  %vm745_vm10 = vcmp.lt.s32.totalorder %v3447_v29, 3  ;;  %v307_v40 = vsub.f32 1.5, %v306_v3 }
  0x88   :  { %v318_v13 = vmul.f32 0.5, %v317_v52  ;;  %v3487_v6 = vshll.u32 %v719_v21, 8  ;;  %v509_v32 = vclz %v508_v42  ;;  %v3489_v35 = vor.u32 %v729_v0, %v728_v12 }
  0x89   :  { %4816 = vst [vmem:[#allocation17_spill] sm:$0xff] %v3482_v63  ;;  %v756_v60 = vsel %vm746_vm7, %v742_v4, 1326507024  ;;  %vm744_vm11 = vcmp.lt.s32.totalorder %v3447_v29, 2  ;;  %v755_v20 = vsel %vm743_vm8, %v3471_v17, %v3473_v2  ;;  %vm310_vm12 = vcmp.eq.f32.partialorder %v3255_v34, inf }
  0x8a   :  { %v341_v19 = vmul.f32 %v3392_v5, %v340_v39  ;;  %v658_v61 = vshll.u32 %v3482_v63, 30  ;;  %v752_v4 = vsel %vm746_vm7, %v739_v31, 920167782  ;;  %v757_v3 = vsel %vm745_vm10, %v739_v31, %v756_v60 }
  0x8b   :  { %v297_v52 = vmul.f32 %v296_v51, %v3249_v23  ;;  %v330_v37 = vmul.f32 0.5, %v329_v56  ;;  %v353_v22 = vmul.f32 %v3404_v11, %v352_v54  ;;  %v364_v28 = vmul.f32 %v3418_v9, %v3360_v7 }
  0x8c   :  { %v308_v21 = vmul.f32 %v3329_v25, %v307_v40  ;;  %v319_v12 = vsub.f32 1.5, %v318_v13  ;;  %v758_v39 = vsel %vm744_vm11, %v755_v20, %v757_v3  ;;  %v760_v0 = vand.u32 65535, %v3487_v6 }
  0x8d   :  { %vm312_vm13 = vcmp.eq.f32.partialorder %v3255_v34, 0.0  ;;  %v2982_v42 = vadd.s32 4294967294, %v509_v32  ;;  %v751_v56 = vsel %vm743_vm8, %v3489_v35, %v3471_v17  ;;  %v753_v31 = vsel %vm745_vm10, %v3473_v2, %v752_v4 }
  0x8e   :  { %v761_v25 = vshrl.u32 %v3487_v6, 16  ;;  %v342_v51 = vmul.f32 0.5, %v341_v19  ;;  %v3520_v54 = vsub.s32 %v655_v50, %v658_v61  ;;  %v762_v40 = vand.u32 65535, %v758_v39 }
  0x8f   :  { %v763_v13 = vshrl.u32 %v758_v39, 16  ;;  %v299_v60 = vsel %vm298_vm6, %v3249_v23, %v297_v52  ;;  %v331_v32 = vsub.f32 1.5, %v330_v37  ;;  %v3525_v20 = vmul.f32 0.5, %v353_v22 }
  0x90   :  { %v365_v3 = vmul.f32 %v3418_v9, %v364_v28  ;;  %v376_v27 = vmul.f32 %v3459_v59, %v3371_v30  ;;  %v754_v4 = vsel %vm744_vm11, %v751_v56, %v753_v31  ;;  %v764_v19 = vmul.u32 %v762_v40, %v760_v0 }
  0x91   :  { %v765_v50 = vmul.u32 %v763_v13, %v760_v0  ;;  %v309_v61 = vmul.f32 %v308_v21, %v3255_v34  ;;  %v320_v39 = vmul.f32 %v3382_v36, %v319_v12  ;;  %vm2983_vm14 = vcmp.lt.s32.totalorder %v2982_v42, 0 }
  0x92   :  { %v3534_v58 = vmul.u32 %v762_v40, %v761_v25  ;;  %v4817_v52 = vand.u32 2147483648, %v3249_v23  ;;  %v343_v22 = vsub.f32 1.5, %v342_v51  ;;  %v661_v28 = vsub.s32 0, %v3520_v54 }
  0x93   :  { %v768_v57 = vshll.u32 %v765_v50, 16  ;;  %v332_v56 = vmul.f32 %v3388_v16, %v331_v32  ;;  %v355_v31 = vsub.f32 1.5, %v3525_v20  ;;  %vm660_vm15 = vcmp.lt.s32.totalorder %v3520_v54, 0 }
  0x94   :  { %v3540_v37 = vsel %vm300_vm9, %v4817_v52, %v299_v60  ;;  %v785_v36 = vshrl.u32 %v754_v4, 16  ;;  %v512_v21 = vsel %vm2983_vm14, 0, %v2982_v42  ;;  %v767_v12 = vmul.u32 %v763_v13, %v761_v25 }
  0x95   :  { %vm772_vm0 = vc.u32 %v764_v19, %v768_v57  ;;  %v868_v40 = vand.u32 2139095040, %v3192_v46  ;;  %v311_v23 = vsel %vm310_vm12, %v3255_v34, %v309_v61  ;;  %v770_v51 = vshll.u32 %v3534_v58, 16 }
  0x96   :  { %v773_v60 = vsel %vm772_vm0, 1, %v4770_v14  ;;  %v784_v52 = vand.u32 65535, %v754_v4  ;;  %v3553_v16 = vmul.f32 %v320_v39, %v3265_v55  ;;  %v3556_v32 = vmul.f32 %v3392_v5, %v343_v22 }
  0x97   :  { %v3558_v42 = vmul.f32 0.5, %v365_v3  ;;  %v662_v13 = vsel %vm660_vm15, %v661_v28, %v3520_v54  ;;  %v377_v20 = vmul.f32 %v3459_v59, %v376_v27  ;;  %v517_v53 = vsub.s32 4294967266, %v512_v21 }
  0x98   :  { %v774_v49 = vadd.s32 %v768_v57, %v764_v19  ;;  %v787_v61 = vmul.u32 %v785_v36, %v760_v0  ;;  %v4818_v44 = vand.u32 2147483648, %v3255_v34  ;;  %v3569_v39 = vmul.f32 %v332_v56, %v3280_v41 }
  0x99   :  { %v775_v5 = vadd.s32 %v773_v60, %v767_v12  ;;  %v869_v22 = vshrl.u32 %v868_v40, 23  ;;  %v663_v3 = vclz %v662_v13  ;;  %v786_v14 = vmul.u32 %v784_v52, %v760_v0 }
  0x9a   :  { %v3566_v4 = vsel %vm312_vm13, %v4818_v44, %v311_v23  ;;  %vm776_vm1 = vc.u32 %v774_v49, %v770_v51  ;;  %v788_v28 = vmul.u32 %v784_v52, %v761_v25  ;;  %vm322_vm2 = vcmp.eq.f32.partialorder %v3265_v55, inf }
  0x9b   :  { %v497_v57 = vadd.s32 %v3299_v1, %v3297_v8  ;;  %v513_v27 = vsub.s32 32, %v512_v21  ;;  %v769_v19 = vshrl.u32 %v765_v50, 16  ;;  %v4819_v63 = vmov 0  }
  0x9c   :  { %v777_v34 = vsel %vm776_vm1, 1, %v4819_v63  ;;  %v518_v44 = vadd.s32 127, %v517_v53  ;;  %v789_v48 = vmul.u32 %v785_v36, %v761_v25  ;;  %v790_v56 = vshll.u32 %v787_v61, 16 }
  0x9d   :  { %v779_v23 = vadd.s32 %v777_v34, %v775_v5  ;;  %v514_v12 = vshll.u32 %v3426_v26, %v512_v21  ;;  %v4820_v40 = vmov 683565275   ;;  %v748_v0 = vsel %vm746_vm7, %v3473_v2, 2102212464 }
  0x9e   :  { %v727_v49 = vshrl.u32 %v4820_v40, %v3438_v45  ;;  %v792_v51 = vshll.u32 %v788_v28, 16  ;;  %v2985_v60 = vadd.s32 4294967294, %v663_v3  ;;  %vm794_vm3 = vc.u32 %v786_v14, %v790_v56 }
  0x9f   :  { %v796_v8 = vadd.s32 %v790_v56, %v786_v14  ;;  %v2990_v1 = vadd.s32 4294967169, %v869_v22  ;;  %v515_v50 = vshrl.u32 %v497_v57, %v513_v27  ;;  %v771_v53 = vshrl.u32 %v3534_v58, 16 }
  0xa0   :  { %v780_v52 = vadd.s32 %v779_v23, %v769_v19  ;;  %v795_v25 = vsel %vm794_vm3, 1, %v4819_v63  ;;  %v519_v36 = vshll.u32 %v518_v44, 23  ;;  %v791_v26 = vshrl.u32 %v787_v61, 16 }
  0xa1   :  { %v797_v21 = vadd.s32 %v795_v25, %v789_v48  ;;  %vm798_vm4 = vc.u32 %v796_v8, %v792_v51  ;;  %vm324_vm5 = vcmp.eq.f32.partialorder %v3265_v55, 0.0  ;;  %vm334_vm6 = vcmp.eq.f32.partialorder %v3280_v41, inf }
  0xa2   :  { %v747_v45 = vsel %vm743_vm8, %v727_v49, %v3489_v35  ;;  %v749_v14 = vsel %vm745_vm10, %v3471_v17, %v748_v0  ;;  %v799_v58 = vsel %vm798_vm4, 1, %v4819_v63  ;;  %v875_v2 = vadd.s32 1, %v2990_v1 }
  0xa3   :  { %v356_v13 = vmul.f32 %v3404_v11, %v355_v31  ;;  %vm2986_vm7 = vcmp.lt.s32.totalorder %v2985_v60, 0  ;;  %v793_v48 = vshrl.u32 %v788_v28, 16  ;;  %v801_v61 = vadd.s32 %v799_v58, %v797_v21 }
  0xa4   :  { %v516_v5 = vor.u32 %v515_v50, %v514_v12  ;;  %v3593_v22 = vadd.s32 %v780_v52, %v771_v53  ;;  %v3595_v3 = vadd.s32 %v796_v8, %v792_v51  ;;  %vm876_vm9 = vcmp.gt.s32.totalorder %v875_v2, 0 }
  0xa5   :  { %v520_v57 = vor.u32 4788187, %v519_v36  ;;  %v750_v35 = vsel %vm744_vm11, %v747_v45, %v749_v14  ;;  %v802_v27 = vadd.s32 %v801_v61, %v791_v26  ;;  %v877_v17 = vsel %vm876_vm9, %v875_v2, 0 }
  0xa6   :  { %v367_v19 = vsub.f32 1.5, %v3558_v42  ;;  %v3600_v34 = vsel %vm2986_vm7, 0, %v2985_v60  ;;  %v4776_v11 = vand.u32 2147483647, %v3192_v46  ;;  %v879_v31 = vand.u32 31, %v877_v17 }
  0xa7   :  { %v323_v28 = vsel %vm322_vm2, %v3265_v55, %v3553_v16  ;;  %v345_v44 = vmul.f32 %v3556_v32, %v3292_v62  ;;  %vm346_vm8 = vcmp.eq.f32.partialorder %v3292_v62, inf  ;;  %v3610_v29 = vmul.f32 0.5, %v377_v20 }
  0xa8   :  { %v803_v23 = vadd.s32 %v802_v27, %v793_v48  ;;  %v3613_v42 = vmul.f32 0.1, %v3540_v37  ;;  %v804_v56 = vmul.u32 %v3487_v6, %v750_v35  ;;  %vm806_vm10 = vc.u32 %v3593_v22, %v3595_v3 }
  0xa9   :  { %v3618_v12 = vsub.s32 32, %v879_v31  ;;  %v521_v49 = vand.u32 2147483647, %v520_v57  ;;  %v523_v16 = vcvt.s32.f32 %v516_v5  ;;  %v671_v0 = vsub.s32 4294967266, %v3600_v34 }
  0xaa   :  { %4821 = vst [vmem:[#allocation18_spill] sm:$0xff] %v3613_v42  ;;  %v807_v32 = vadd.s32 1, %v803_v23  ;;  %v872_v20 = vand.u32 8388607, %v4776_v11  ;;  %v3623_v51 = vshrl.u32 %v877_v17, 5  ;;  %v882_v37 = vshll.u32 %v4820_v40, %v879_v31 }
  0xab   :  { %v4822_v60 = vmov 2475754826   ;;  %vm336_vm11 = vcmp.eq.f32.partialorder %v3280_v41, 0.0  ;;  %v4823_v1 = vmov 2131351028   ;;  %v4826_v58 = vand.u32 2147483648, %v3265_v55 }
  0xac   :  { %v885_v8 = vshll.u32 %v4822_v60, %v879_v31  ;;  %v808_v6 = vsel %vm806_vm10, %v807_v32, %v803_v23  ;;  %v888_v50 = vshll.u32 %v4823_v1, %v879_v31  ;;  %v4824_v53 = vmov 2102212464  }
  0xad   :  { %v891_v52 = vshll.u32 %v4824_v53, %v879_v31  ;;  %v4825_v25 = vmov 920167782   ;;  %v809_v26 = vadd.s32 %v808_v6, %v804_v56  ;;  %v883_v21 = vshrl.u32 %v4822_v60, %v3618_v12 }
  0xae   :  { %v892_v36 = vshrl.u32 %v4825_v25, %v3618_v12  ;;  %v886_v45 = vshrl.u32 %v4823_v1, %v3618_v12  ;;  %v889_v14 = vshrl.u32 %v4824_v53, %v3618_v12  ;;  %v326_v2 = vsel %vm324_vm5, %v4826_v58, %v323_v28 }
  0xaf   :  { %v335_v48 = vsel %vm334_vm6, %v3280_v41, %v3569_v39  ;;  %vm348_vm12 = vcmp.eq.f32.partialorder %v3292_v62, 0.0  ;;  %v357_v61 = vmul.f32 %v356_v13, %v3339_v38  ;;  %vm358_vm13 = vcmp.eq.f32.partialorder %v3339_v38, inf }
  0xb0   :  { %v894_v5 = vshll.u32 %v4825_v25, %v879_v31  ;;  %vm405_vm14 = vcmp.lt.s32.totalorder %v3176_v24, 0  ;;  %v524_v57 = vmul.f32 %v523_v16, %v521_v49  ;;  %v651_v55 = vadd.s32 %v3422_v18, %v3433_v15 }
  0xb1   :  { %v667_v35 = vsub.s32 32, %v3600_v34  ;;  %v810_v27 = vadd.s32 536870912, %v809_v26  ;;  %v672_v17 = vadd.s32 127, %v671_v0  ;;  %v873_v28 = vor.u32 8388608, %v872_v20 }
  0xb2   :  { %v893_v39 = vor.u32 %v892_v36, %v891_v52  ;;  %v895_v23 = vshrl.u32 %v4815_v33, %v3618_v12  ;;  %v3656_v13 = vor.u32 %v883_v21, %v882_v37  ;;  %v3658_v56 = vor.u32 %v886_v45, %v885_v8 }
  0xb3   :  { %v3660_v31 = vor.u32 %v889_v14, %v888_v50  ;;  %vm900_vm15 = vcmp.lt.s32.totalorder %v3623_v51, 4  ;;  %vm360_vm0 = vcmp.eq.f32.partialorder %v3339_v38, 0.0  ;;  %v368_v18 = vmul.f32 %v3418_v9, %v367_v19 }
  0xb4   :  { %v4827_v15 = vand.u32 2147483647, %v3176_v24  ;;  %v3671_v16 = vshrl.u32 %v810_v27, 30  ;;  %v896_v0 = vor.u32 %v895_v23, %v894_v5  ;;  %vm897_vm2 = vcmp.lt.s32.totalorder %v3623_v51, 1 }
  0xb5   :  { %v347_v32 = vsel %vm346_vm8, %v3292_v62, %v345_v44  ;;  %v668_v20 = vshll.u32 %v3520_v54, %v3600_v34  ;;  %v669_v37 = vshrl.u32 %v651_v55, %v667_v35  ;;  %vm899_vm3 = vcmp.lt.s32.totalorder %v3623_v51, 3 }
  0xb6   :  { %vm3667_vm1 = vcmp.le.f32.partialorder %v4827_v15, 0.7853982  ;;  %v673_v9 = vshll.u32 %v672_v17, 23  ;;  %v906_v19 = vsel %vm900_vm15, %v893_v39, 920167782  ;;  %v3684_v6 = vshll.u32 %v873_v28, 8 }
  0xb7   :  { %v910_v8 = vsel %vm900_vm15, %v896_v0, 1326507024  ;;  %v525_v50 = vxor.u32 2147483648, %v524_v57  ;;  %vm898_vm4 = vcmp.lt.s32.totalorder %v3623_v51, 2  ;;  %v905_v54 = vsel %vm897_vm2, %v3656_v13, %v3658_v56 }
  0xb8   :  { %v909_v34 = vsel %vm897_vm2, %v3658_v56, %v3660_v31  ;;  %v812_v44 = vshll.u32 %v3671_v16, 30  ;;  %v907_v52 = vsel %vm899_vm3, %v3660_v31, %v906_v19  ;;  %v911_v36 = vsel %vm899_vm3, %v893_v39, %v910_v8 }
  0xb9   :  { %v1022_v21 = vand.u32 2139095040, %v3194_v47  ;;  %v4830_v45 = vand.u32 2147483648, %v3280_v41  ;;  %v379_v58 = vsub.f32 1.5, %v3610_v29  ;;  %v670_v5 = vor.u32 %v669_v37, %v668_v20 }
  0xba   :  { %v915_v55 = vshrl.u32 %v3684_v6, 16  ;;  %v674_v35 = vor.u32 4788187, %v673_v9  ;;  %v908_v27 = vsel %vm898_vm4, %v905_v54, %v907_v52  ;;  %v912_v17 = vsel %vm898_vm4, %v909_v34, %v911_v36 }
  0xbb   :  { %v338_v14 = vsel %vm336_vm11, %v4830_v45, %v335_v48  ;;  %v914_v28 = vand.u32 65535, %v3684_v6  ;;  %v4831_v39 = vand.u32 2147483648, %v3292_v62  ;;  %v359_v29 = vsel %vm358_vm13, %v3339_v38, %v357_v61 }
  0xbc   :  { %v3721_v48 = vmul.f32 0.1, %v3566_v4  ;;  %v916_v23 = vand.u32 65535, %v912_v17  ;;  %v526_v15 = vsel %vm405_vm14, %v525_v50, %v524_v57  ;;  %v3725_v0 = vsub.s32 %v809_v26, %v812_v44 }
  0xbd   :  { %v350_v41 = vsel %vm348_vm12, %v4831_v39, %v347_v32  ;;  %v917_v20 = vshrl.u32 %v912_v17, 16  ;;  %v1023_v37 = vshrl.u32 %v1022_v21, 23  ;;  %v3728_v9 = vmul.f32 %v368_v18, %v3360_v7 }
  0xbe   :  { %4832 = vst [vmem:[#allocation19_spill] sm:$0xff] %v3721_v48  ;;  %v3730_v62 = vmul.f32 0.1, %v326_v2  ;;  %v920_v32 = vmul.u32 %v916_v23, %v915_v55  ;;  %v939_v19 = vshrl.u32 %v908_v27, 16  ;;  %v675_v8 = vand.u32 2147483647, %v674_v35 }
  0xbf   :  { %v677_v61 = vcvt.s32.f32 %v670_v5  ;;  %v919_v54 = vmul.u32 %v917_v20, %v914_v28  ;;  %v938_v4 = vand.u32 65535, %v908_v27  ;;  %v4834_v34 = vand.u32 2147483648, %v3339_v38 }
  0xc0   :  { %4833 = vst [vmem:[#allocation20_spill] sm:$0xff] %v3730_v62  ;;  %v3739_v26 = vmul.f32 %v3459_v59, %v379_v58  ;;  %v3744_v2 = vsel %vm3667_vm1, %v3176_v24, %v526_v15  ;;  %v918_v18 = vmul.u32 %v916_v23, %v914_v28  ;;  %v3746_v50 = vmul.f32 0.1, %v338_v14 }
  0xc1   :  { %v3736_v57 = vsel %vm360_vm0, %v4834_v34, %v359_v29  ;;  %v815_v44 = vsub.s32 0, %v3725_v0  ;;  %v922_v52 = vshll.u32 %v919_v54, 16  ;;  %v2993_v36 = vadd.s32 4294967169, %v1023_v37 }
  0xc2   :  { %4835 = vst [vmem:[#allocation21_spill] sm:$0xff] %v3746_v50  ;;  %vm370_vm5 = vcmp.eq.f32.partialorder %v3360_v7, inf  ;;  %vm814_vm6 = vcmp.lt.s32.totalorder %v3725_v0, 0  ;;  %v921_v38 = vmul.u32 %v917_v20, %v915_v55  ;;  %v924_v21 = vshll.u32 %v920_v32, 16 }
  0xc3   :  { %v941_v59 = vmul.u32 %v939_v19, %v914_v28  ;;  %v3751_v45 = vmul.f32 0.1, %v350_v41  ;;  %v3755_v58 = vmul.f32 %v3744_v2, %v3744_v2  ;;  %v3757_v5 = vmul.f32 %v677_v61, %v675_v8 }
  0xc4   :  { %v942_v14 = vmul.u32 %v938_v4, %v915_v55  ;;  %v881_v35 = vshrl.u32 %v4820_v40, %v3618_v12  ;;  %vm926_vm7 = vc.u32 %v918_v18, %v922_v52  ;;  %v928_v27 = vadd.s32 %v922_v52, %v918_v18 }
  0xc5   :  { %4836 = vst [vmem:[#allocation22_spill] sm:$0xff] %v3751_v45  ;;  %v940_v17 = vmul.u32 %v938_v4, %v914_v28  ;;  %v816_v39 = vsel %vm814_vm6, %v815_v44, %v3725_v0  ;;  %v923_v29 = vshrl.u32 %v919_v54, 16  ;;  %v927_v23 = vsel %vm926_vm7, 1, %v4819_v63 }
  0xc6   :  { %v1029_v41 = vadd.s32 1, %v2993_v36  ;;  %v929_v15 = vadd.s32 %v927_v23, %v921_v38  ;;  %vm930_vm9 = vc.u32 %v928_v27, %v924_v21  ;;  %v943_v20 = vmul.u32 %v939_v19, %v915_v55 }
  0xc7   :  { %v944_v37 = vshll.u32 %v941_v59, 16  ;;  %v902_v8 = vsel %vm900_vm15, %v3660_v31, 2102212464  ;;  %v931_v61 = vsel %vm930_vm9, 1, %v4819_v63  ;;  %v946_v12 = vshll.u32 %v942_v14, 16 }
  0xc8   :  { %v4775_v34 = vand.u32 2147483647, %v3194_v47  ;;  %v925_v28 = vshrl.u32 %v920_v32, 16  ;;  %v933_v4 = vadd.s32 %v931_v61, %v929_v15  ;;  %v817_v18 = vclz %v816_v39 }
  0xc9   :  { %vm948_vm8 = vc.u32 %v940_v17, %v944_v37  ;;  %v950_v54 = vadd.s32 %v944_v37, %v940_v17  ;;  %v901_v44 = vsel %vm897_vm2, %v881_v35, %v3656_v13  ;;  %vm1030_vm10 = vcmp.gt.s32.totalorder %v1029_v41, 0 }
  0xca   :  { %v949_v55 = vsel %vm948_vm8, 1, %v4819_v63  ;;  %v934_v19 = vadd.s32 %v933_v4, %v923_v29  ;;  %v945_v52 = vshrl.u32 %v941_v59, 16  ;;  %v903_v36 = vsel %vm899_vm3, %v3658_v56, %v902_v8 }
  0xcb   :  { %v951_v31 = vadd.s32 %v949_v55, %v943_v20  ;;  %vm952_vm11 = vc.u32 %v950_v54, %v946_v12  ;;  %v3776_v38 = vadd.s32 %v950_v54, %v946_v12  ;;  %v1031_v21 = vsel %vm1030_vm10, %v1029_v41, 0 }
  0xcc   :  { %v953_v32 = vsel %vm952_vm11, 1, %v4819_v63  ;;  %vm372_vm12 = vcmp.eq.f32.partialorder %v3360_v7, 0.0  ;;  %v3779_v27 = vadd.s32 %v934_v19, %v925_v28  ;;  %v947_v13 = vshrl.u32 %v942_v14, 16 }
  0xcd   :  { %v955_v35 = vadd.s32 %v953_v32, %v951_v31  ;;  %v1033_v17 = vand.u32 31, %v1031_v21  ;;  %v371_v59 = vsel %vm370_vm5, %v3360_v7, %v3728_v9  ;;  %v539_v39 = vmul.f32 -0.00019511016, %v3755_v58 }
  0xce   :  { %v4837_v56 = vand.u32 2147483647, %v3188_v43  ;;  %vm559_vm15 = vcmp.lt.s32.totalorder %v3188_v43, 0  ;;  %v679_v23 = vxor.u32 2147483648, %v3757_v5  ;;  %v2988_v14 = vadd.s32 4294967294, %v817_v18 }
  0xcf   :  { %v956_v41 = vadd.s32 %v955_v35, %v945_v52  ;;  %v3794_v15 = vsub.s32 32, %v1033_v17  ;;  %v904_v20 = vsel %vm898_vm4, %v901_v44, %v903_v36  ;;  %vm960_vm0 = vc.u32 %v3779_v27, %v3776_v38 }
  0xd0   :  { %vm3788_vm13 = vcmp.le.f32.partialorder %v4837_v56, 0.7853982  ;;  %v1026_v9 = vand.u32 8388607, %v4775_v34  ;;  %v1036_v37 = vshll.u32 %v4820_v40, %v1033_v17  ;;  %v1039_v12 = vshll.u32 %v4822_v60, %v1033_v17 }
  0xd1   :  { %v957_v8 = vadd.s32 %v956_v41, %v947_v13  ;;  %v1037_v61 = vshrl.u32 %v4822_v60, %v3794_v15  ;;  %v1042_v28 = vshll.u32 %v4823_v1, %v1033_v17  ;;  %v1040_v51 = vshrl.u32 %v4823_v1, %v3794_v15 }
  0xd2   :  { %v1043_v4 = vshrl.u32 %v4824_v53, %v3794_v15  ;;  %v1045_v54 = vshll.u32 %v4824_v53, %v1033_v17  ;;  %v1046_v18 = vshrl.u32 %v4825_v25, %v3794_v15  ;;  %vm2989_vm2 = vcmp.lt.s32.totalorder %v2988_v14, 0 }
  0xd3   :  { %v958_v44 = vmul.u32 %v3684_v6, %v904_v20  ;;  %v961_v55 = vadd.s32 1, %v957_v8  ;;  %v3815_v19 = vshrl.u32 %v1031_v21, 5  ;;  %v532_v52 = vmul.f32 -0.001358992, %v3755_v58 }
  0xd4   :  { %v540_v31 = vadd.f32 0.008332121, %v539_v39  ;;  %v680_v36 = vsel %vm559_vm15, %v679_v23, %v3757_v5  ;;  %v1048_v32 = vshll.u32 %v4825_v25, %v1033_v17  ;;  %vm382_vm3 = vcmp.eq.f32.partialorder %v3371_v30, inf }
  0xd5   :  { %v962_v13 = vsel %vm960_vm0, %v961_v55, %v957_v8  ;;  %v1027_v35 = vor.u32 8388608, %v1026_v9  ;;  %v1047_v6 = vor.u32 %v1046_v18, %v1045_v54  ;;  %v1049_v21 = vshrl.u32 %v4815_v33, %v3794_v15 }
  0xd6   :  { %v820_v56 = vsel %vm2989_vm2, 0, %v2988_v14  ;;  %v3828_v41 = vor.u32 %v1037_v61, %v1036_v37  ;;  %v3830_v39 = vor.u32 %v1040_v51, %v1039_v12  ;;  %v3832_v20 = vor.u32 %v1043_v4, %v1042_v28 }
  0xd7   :  { %v3834_v5 = vadd.s32 %v962_v13, %v958_v44  ;;  %v1050_v17 = vor.u32 %v1049_v21, %v1048_v32  ;;  %vm1051_vm4 = vcmp.lt.s32.totalorder %v3815_v19, 1  ;;  %vm1054_vm5 = vcmp.lt.s32.totalorder %v3815_v19, 4 }
  0xd8   :  { %v4840_v23 = vand.u32 2147483648, %v3360_v7  ;;  %v381_v14 = vmul.f32 %v3739_v26, %v3371_v30  ;;  %v3845_v37 = vmul.f32 0.1, %v3736_v57  ;;  %vm1053_vm6 = vcmp.lt.s32.totalorder %v3815_v19, 3 }
  0xd9   :  { %v527_v8 = vsub.s32 4, %v3390_v10  ;;  %v3852_v61 = vsel %vm3788_vm13, %v3188_v43, %v680_v36  ;;  %v825_v12 = vsub.s32 4294967266, %v820_v56  ;;  %v1060_v7 = vsel %vm1054_vm5, %v1047_v6, 920167782 }
  0xda   :  { %v374_v9 = vsel %vm372_vm12, %v4840_v23, %v371_v59  ;;  %4841 = vst [vmem:[#allocation23_spill] sm:$0xff] %v3845_v37  ;;  %v533_v59 = vadd.f32 0.041655596, %v532_v52  ;;  %v541_v28 = vmul.f32 %v540_v31, %v3755_v58  ;;  %vm1052_vm7 = vcmp.lt.s32.totalorder %v3815_v19, 2 }
  0xdb   :  { %v1059_v57 = vsel %vm1051_vm4, %v3828_v41, %v3830_v39  ;;  %v964_v26 = vadd.s32 536870912, %v3834_v5  ;;  %v1061_v51 = vsel %vm1053_vm6, %v3832_v20, %v1060_v7  ;;  %v1064_v4 = vsel %vm1054_vm5, %v1050_v17, 1326507024 }
  0xdc   :  { %v3868_v54 = vshll.u32 %v1027_v35, 8  ;;  %v3870_v18 = vmul.f32 0.1, %v374_v9  ;;  %v3874_v44 = vmul.f32 %v3852_v61, %v3852_v61  ;;  %v805_v55 = vadd.s32 %v3595_v3, %v3593_v22 }
  0xdd   :  { %v1063_v52 = vsel %vm1051_vm4, %v3830_v39, %v3832_v20  ;;  %v821_v31 = vsub.s32 32, %v820_v56  ;;  %v826_v36 = vadd.s32 127, %v825_v12  ;;  %v1062_v32 = vsel %vm1052_vm7, %v1059_v57, %v1061_v51 }
  0xde   :  { %4842 = vst [vmem:[#allocation24_spill] sm:$0xff] %v3870_v18  ;;  %v1065_v13 = vsel %vm1053_vm6, %v1047_v6, %v1064_v4  ;;  %v528_v35 = vsel %vm405_vm14, %v527_v8, %v3390_v10  ;;  %v534_v21 = vmul.f32 %v533_v59, %v3755_v58  ;;  %v542_v22 = vadd.f32 -0.16666654, %v541_v28 }
  0xdf   :  { %v686_v3 = vmul.f32 -0.001358992, %v3874_v44  ;;  %v3891_v17 = vshrl.u32 %v964_v26, 30  ;;  %v1066_v23 = vsel %vm1052_vm7, %v1063_v52, %v1065_v13  ;;  %v1068_v9 = vand.u32 65535, %v3868_v54 }
  0xe0   :  { %v1069_v12 = vshrl.u32 %v3868_v54, 16  ;;  %v3900_v6 = vsel %vm382_vm3, %v3371_v30, %v381_v14  ;;  %v693_v10 = vmul.f32 -0.00019511016, %v3874_v44  ;;  %v822_v8 = vshll.u32 %v3725_v0, %v820_v56 }
  0xe1   :  { %v1093_v7 = vshrl.u32 %v1062_v32, 16  ;;  %v823_v59 = vshrl.u32 %v805_v55, %v821_v31  ;;  %v827_v28 = vshll.u32 %v826_v36, 23  ;;  %v1070_v57 = vand.u32 65535, %v1066_v23 }
  0xe2   :  { %v1071_v26 = vshrl.u32 %v1066_v23, 16  ;;  %v3906_v51 = vsel %vm3667_vm1, 0, %v528_v35  ;;  %v535_v4 = vadd.f32 -0.4999988, %v534_v21  ;;  %v543_v52 = vmul.f32 %v542_v22, %v3755_v58  ;;  %v4844_v35 = vld [vmem:[#allocation14_spill] sm:$0xff]  ;;  %v4845_v22 = vld [vmem:[#allocation17_spill] sm:$0xff] }
  0xe3   :  { %4843 = vst [vmem:[#allocation25_spill] sm:$0xff] %v3906_v51  ;;  %v1092_v13 = vand.u32 65535, %v1062_v32  ;;  %v687_v34 = vadd.f32 0.041655596, %v686_v3  ;;  %v966_v14 = vshll.u32 %v3891_v17, 30  ;;  %v1074_v18 = vmul.u32 %v1070_v57, %v1069_v12 }
  0xe4   :  { %v1073_v11 = vmul.u32 %v1071_v26, %v1068_v9  ;;  %v3911_v0 = vand.u32 3, %v3906_v51  ;;  %v694_v56 = vadd.f32 0.008332121, %v693_v10  ;;  %v1072_v55 = vmul.u32 %v1070_v57, %v1068_v9 }
  0xe5   :  { %v1095_v31 = vmul.u32 %v1093_v7, %v1068_v9  ;;  %v824_v36 = vor.u32 %v823_v59, %v822_v8  ;;  %v828_v23 = vor.u32 4788187, %v827_v28  ;;  %v1176_v37 = vand.u32 2139095040, %v4844_v35 }
  0xe6   :  { %v1076_v49 = vshll.u32 %v1073_v11, 16  ;;  %v536_v21 = vmul.f32 %v535_v4, %v3755_v58  ;;  %v681_v32 = vsub.s32 4, %v4845_v22  ;;  %v1078_v3 = vshll.u32 %v1074_v18, 16 }
  0xe7   :  { %v1096_v45 = vmul.u32 %v1092_v13, %v1069_v12  ;;  %v544_v50 = vadd.f32 1.0, %v543_v52  ;;  %v688_v62 = vmul.f32 %v687_v34, %v3874_v44  ;;  %v3918_v48 = vsub.s32 %v3834_v5, %v966_v14 }
  0xe8   :  { %v1075_v10 = vmul.u32 %v1071_v26, %v1069_v12  ;;  %vm1080_vm14 = vc.u32 %v1072_v55, %v1076_v49  ;;  %v1082_v57 = vadd.s32 %v1076_v49, %v1072_v55  ;;  %v1094_v8 = vmul.u32 %v1092_v13, %v1068_v9 }
  0xe9   :  { %v1098_v59 = vshll.u32 %v1095_v31, 16  ;;  %v695_v28 = vmul.f32 %v694_v56, %v3874_v44  ;;  %v829_v42 = vand.u32 2147483647, %v828_v23  ;;  %v831_v51 = vcvt.s32.f32 %v824_v36 }
  0xea   :  { %v1177_v58 = vshrl.u32 %v1176_v37, 23  ;;  %v1081_v4 = vsel %vm1080_vm14, 1, %v4819_v63  ;;  %vm1084_vm1 = vc.u32 %v1082_v57, %v1078_v3  ;;  %v1097_v47 = vmul.u32 %v1093_v7, %v1069_v12 }
  0xeb   :  { %v1100_v52 = vshll.u32 %v1096_v45, 16  ;;  %v1035_v34 = vshrl.u32 %v4820_v40, %v3794_v15  ;;  %v1056_v5 = vsel %vm1054_vm5, %v3832_v20, 2102212464  ;;  %v1077_v26 = vshrl.u32 %v1073_v11, 16 }
  0xec   :  { %v1083_v9 = vadd.s32 %v1081_v4, %v1075_v10  ;;  %vm968_vm9 = vcmp.lt.s32.totalorder %v3918_v48, 0  ;;  %v1085_v13 = vsel %vm1084_vm1, 1, %v4819_v63  ;;  %vm1102_vm8 = vc.u32 %v1094_v8, %v1098_v59 }
  0xed   :  { %v1104_v37 = vadd.s32 %v1098_v59, %v1094_v8  ;;  %v969_v14 = vsub.s32 0, %v3918_v48  ;;  %v1079_v56 = vshrl.u32 %v1074_v18, 16  ;;  %v1103_v7 = vsel %vm1102_vm8, 1, %v4819_v63 }
  0xee   :  { %v1087_v12 = vadd.s32 %v1085_v13, %v1083_v9  ;;  %v1099_v55 = vshrl.u32 %v1095_v31, 16  ;;  %v1105_v15 = vadd.s32 %v1103_v7, %v1097_v47  ;;  %v2996_v36 = vadd.s32 4294967169, %v1177_v58 }
  0xef   :  { %vm1106_vm10 = vc.u32 %v1104_v37, %v1100_v52  ;;  %v1055_v11 = vsel %vm1051_vm4, %v1035_v34, %v3828_v41  ;;  %v1057_v20 = vsel %vm1053_vm6, %v3830_v39, %v1056_v5  ;;  %vm552_vm11 = vcmp.eq.s32.totalorder %v3911_v0, 2 }
  0xf0   :  { %v1088_v23 = vadd.s32 %v1087_v12, %v1077_v26  ;;  %v1107_v49 = vsel %vm1106_vm10, 1, %v4819_v63  ;;  %v682_v18 = vsel %vm559_vm15, %v681_v32, %v4845_v22  ;;  %v1101_v47 = vshrl.u32 %v1096_v45, 16 }
  0xf1   :  { %v1109_v31 = vadd.s32 %v1107_v49, %v1105_v15  ;;  %v1183_v3 = vadd.s32 1, %v2996_v36  ;;  %v3942_v10 = vadd.f32 1.0, %v536_v21  ;;  %v970_v41 = vsel %vm968_vm9, %v969_v14, %v3918_v48 }
  0xf2   :  { %v3947_v57 = vadd.s32 %v1088_v23, %v1079_v56  ;;  %v3949_v39 = vadd.s32 %v1104_v37, %v1100_v52  ;;  %v3952_v8 = vmul.f32 %v544_v50, %v3744_v2  ;;  %v1058_v59 = vsel %vm1052_vm7, %v1055_v11, %v1057_v20  ;;  %v4847_v50 = vld [vmem:[#allocation12_spill] sm:$0xff] }
  0xf3   :  { %4846 = vst [vmem:[#allocation14_spill] sm:$0xff] %v3942_v10  ;;  %v1110_v22 = vadd.s32 %v1109_v31, %v1099_v55  ;;  %vm1184_vm12 = vcmp.gt.s32.totalorder %v1183_v3, 0  ;;  %v689_v45 = vadd.f32 -0.4999988, %v688_v62  ;;  %v696_v32 = vadd.f32 -0.16666654, %v695_v28 }
  0xf4   :  { %v832_v21 = vmul.f32 %v831_v51, %v829_v42  ;;  %v1185_v58 = vsel %vm1184_vm12, %v1183_v3, 0  ;;  %v971_v4 = vclz %v970_v41  ;;  %v4791_v5 = vand.u32 2147483647, %v4844_v35 }
  0xf5   :  { %v1111_v34 = vadd.s32 %v1110_v22, %v1101_v47  ;;  %v1187_v26 = vand.u32 31, %v1185_v58  ;;  %vm549_vm15 = vcmp.eq.s32.totalorder %v3911_v0, 0  ;;  %v3960_v2 = vsel %vm3788_vm13, 0, %v682_v18 }
  0xf6   :  { %vm713_vm0 = vcmp.lt.s32.totalorder %v4847_v50, 0  ;;  %v1112_v19 = vmul.u32 %v3868_v54, %v1058_v59  ;;  %vm1114_vm2 = vc.u32 %v3947_v57, %v3949_v39  ;;  %v3967_v42 = vand.u32 3, %v3960_v2 }
  0xf7   :  { %v4848_v62 = vand.u32 2147483647, %v4847_v50  ;;  %v1115_v28 = vadd.s32 1, %v1111_v34  ;;  %v3975_v29 = vsub.s32 32, %v1187_v26  ;;  %v4790_v52 = vxor.u32 2147483648, %v3952_v8 }
  0xf8   :  { %v4789_v9 = vxor.u32 2147483648, %v3942_v10  ;;  %v690_v54 = vmul.f32 %v689_v45, %v3874_v44  ;;  %v697_v13 = vmul.f32 %v696_v32, %v3874_v44  ;;  %vm548_vm13 = vcmp.lt.s32.totalorder %v3911_v0, 2 }
  0xf9   :  { %vm3971_vm3 = vcmp.le.f32.partialorder %v4848_v62, 0.7853982  ;;  %v833_v37 = vxor.u32 2147483648, %v832_v21  ;;  %v2991_v14 = vadd.s32 4294967294, %v971_v4  ;;  %v1116_v56 = vsel %vm1114_vm2, %v1115_v28, %v1111_v34 }
  0xfa   :  { %v1180_v12 = vand.u32 8388607, %v4791_v5  ;;  %v1117_v7 = vadd.s32 %v1116_v56, %v1112_v19  ;;  %v1193_v55 = vshll.u32 %v4822_v60, %v1187_v26  ;;  %v1196_v15 = vshll.u32 %v4823_v1, %v1187_v26 }
  0xfb   :  { %v1199_v36 = vshll.u32 %v4824_v53, %v1187_v26  ;;  %v1194_v11 = vshrl.u32 %v4823_v1, %v3975_v29  ;;  %v1197_v44 = vshrl.u32 %v4824_v53, %v3975_v29  ;;  %v1200_v20 = vshrl.u32 %v4825_v25, %v3975_v29 }
  0xfc   :  { %v1202_v23 = vshll.u32 %v4825_v25, %v1187_v26  ;;  %v554_v49 = vsel %vm552_vm11, %v4789_v9, %v3952_v8  ;;  %v698_v18 = vadd.f32 1.0, %v697_v13  ;;  %v1118_v47 = vadd.s32 536870912, %v1117_v7 }
  0xfd   :  { %v3999_v31 = vshrl.u32 %v1185_v58, 5  ;;  %v4001_v3 = vadd.f32 1.0, %v690_v54  ;;  %v834_v41 = vsel %vm713_vm0, %v833_v37, %v832_v21  ;;  %v1181_v59 = vor.u32 8388608, %v1180_v12 }
  0xfe   :  { %v1203_v22 = vshrl.u32 %v4815_v33, %v3975_v29  ;;  %vm2992_vm4 = vcmp.lt.s32.totalorder %v2991_v14, 0  ;;  %v4007_v45 = vshrl.u32 %v1118_v47, 30  ;;  %v1190_v32 = vshll.u32 %v4820_v40, %v1187_v26 }
  0xff   :  { %4851 = vst [vmem:[#allocation17_spill] sm:$0xff] %v4001_v3  ;;  %v1191_v4 = vshrl.u32 %v4822_v60, %v3975_v29  ;;  %v4012_v34 = vor.u32 %v1194_v11, %v1193_v55  ;;  %v4014_v58 = vor.u32 %v1197_v44, %v1196_v15  ;;  %v1201_v19 = vor.u32 %v1200_v20, %v1199_v36 }
 0x100   :  { %v1204_v62 = vor.u32 %v1203_v22, %v1202_v23  ;;  %v4017_v21 = vmul.f32 %v698_v18, %v3852_v61  ;;  %v1120_v28 = vshll.u32 %v4007_v45, 30  ;;  %vm1205_vm5 = vcmp.lt.s32.totalorder %v3999_v31, 1 }
 0x101   :  { %vm1208_vm6 = vcmp.lt.s32.totalorder %v3999_v31, 4  ;;  %vm384_vm7 = vcmp.eq.f32.partialorder %v3371_v30, 0.0  ;;  %v551_v26 = vsel %vm549_vm15, %v3942_v10, %v4790_v52  ;;  %vm703_vm14 = vcmp.eq.s32.totalorder %v3967_v42, 0 }
 0x102   :  { %4852 = vst [vmem:[#allocation12_spill] sm:$0xff] %v4017_v21  ;;  %vm706_vm1 = vcmp.eq.s32.totalorder %v3967_v42, 2  ;;  %v4030_v61 = vshll.u32 %v1181_v59, 8  ;;  %v4035_v54 = vsel %vm3971_vm3, %v4847_v50, %v834_v41  ;;  %v974_v13 = vsel %vm2992_vm4, 0, %v2991_v14 }
 0x103   :  { %v4038_v37 = vor.u32 %v1191_v4, %v1190_v32  ;;  %vm1207_vm9 = vcmp.lt.s32.totalorder %v3999_v31, 3  ;;  %vm546_vm8 = vweird.f32 %v3176_v24  ;;  %vm702_vm10 = vcmp.lt.s32.totalorder %v3967_v42, 2 }
 0x104   :  { %vm1206_vm11 = vcmp.lt.s32.totalorder %v3999_v31, 2  ;;  %v1214_v56 = vsel %vm1208_vm6, %v1201_v19, 920167782  ;;  %v1217_v12 = vsel %vm1205_vm5, %v4012_v34, %v4014_v58  ;;  %v1218_v14 = vsel %vm1208_vm6, %v1204_v62, 1326507024 }
 0x105   :  { %v555_v55 = vsel %vm548_vm13, %v551_v26, %v554_v49  ;;  %v4788_v15 = vxor.u32 2147483648, %v4017_v21  ;;  %v4787_v36 = vxor.u32 2147483648, %v4001_v3  ;;  %v4056_v11 = vsub.s32 %v1117_v7, %v1120_v28 }
 0x106   :  { %v959_v44 = vadd.s32 %v3776_v38, %v3779_v27  ;;  %v979_v20 = vsub.s32 4294967266, %v974_v13  ;;  %v1219_v23 = vsel %vm1207_vm9, %v1201_v19, %v1218_v14  ;;  %v1222_v18 = vand.u32 65535, %v4030_v61 }
 0x107   :  { %v4065_v47 = vmul.f32 %v4035_v54, %v4035_v54  ;;  %v1213_v0 = vsel %vm1205_vm5, %v4038_v37, %v4012_v34  ;;  %v1215_v7 = vsel %vm1207_vm9, %v4014_v58, %v1214_v56  ;;  %v1220_v38 = vsel %vm1206_vm11, %v1217_v12, %v1219_v23 }
 0x108   :  { %v975_v27 = vsub.s32 32, %v974_v13  ;;  %v1223_v49 = vshrl.u32 %v4030_v61, 16  ;;  %v1224_v41 = vand.u32 65535, %v1220_v38  ;;  %v1225_v59 = vshrl.u32 %v1220_v38, 16 }
 0x109   :  { %v705_v22 = vsel %vm703_vm14, %v4001_v3, %v4788_v15  ;;  %v708_v32 = vsel %vm706_vm1, %v4787_v36, %v4017_v21  ;;  %v835_v4 = vsub.s32 4, %v3671_v16  ;;  %v1123_v19 = vsub.s32 0, %v4056_v11 }
 0x10a   :  { %v980_v62 = vadd.s32 127, %v979_v20  ;;  %vm1122_vm12 = vcmp.lt.s32.totalorder %v4056_v11, 0  ;;  %v1216_v28 = vsel %vm1206_vm11, %v1213_v0, %v1215_v7  ;;  %v1227_v26 = vmul.u32 %v1225_v59, %v1222_v18 }
 0x10b   :  { %v840_v56 = vmul.f32 -0.001358992, %v4065_v47  ;;  %v847_v12 = vmul.f32 -0.00019511016, %v4065_v47  ;;  %v976_v14 = vshll.u32 %v3918_v48, %v974_v13  ;;  %v1228_v23 = vmul.u32 %v1224_v41, %v1223_v49 }
 0x10c   :  { %v977_v38 = vshrl.u32 %v959_v44, %v975_v27  ;;  %v1226_v36 = vmul.u32 %v1224_v41, %v1222_v18  ;;  %v1230_v15 = vshll.u32 %v1227_v26, 16  ;;  %v1246_v9 = vand.u32 65535, %v1216_v28  ;;  %v4856_v27 = vld [vmem:[#allocation15_spill] sm:$0xff] }
 0x10d   :  { %v4853_v20 = vand.u32 2147483648, %v3371_v30  ;;  %v4104_v0 = vsel %vm546_vm8, nan, %v555_v55  ;;  %v1124_v7 = vsel %vm1122_vm12, %v1123_v19, %v4056_v11  ;;  %v1247_v5 = vshrl.u32 %v1216_v28, 16 }
 0x10e   :  { %4855 = vst [vmem:[#allocation27_spill] sm:$0xff] %v4104_v0  ;;  %v836_v48 = vsel %vm713_vm0, %v835_v4, %v3671_v16  ;;  %v981_v13 = vshll.u32 %v980_v62, 23  ;;  %v1229_v44 = vmul.u32 %v1225_v59, %v1223_v49  ;;  %v1330_v41 = vand.u32 2139095040, %v4856_v27 }
 0x10f   :  { %v4100_v52 = vsel %vm384_vm7, %v4853_v20, %v3900_v6  ;;  %v709_v30 = vsel %vm702_vm10, %v705_v22, %v708_v32  ;;  %v841_v6 = vadd.f32 0.041655596, %v840_v56  ;;  %v848_v20 = vadd.f32 0.008332121, %v847_v12 }
 0x110   :  { %4854 = vst [vmem:[#allocation26_spill] sm:$0xff] %v4100_v52  ;;  %v1232_v52 = vshll.u32 %v1228_v23, 16  ;;  %v978_v24 = vor.u32 %v977_v38, %v976_v14  ;;  %v1125_v55 = vclz %v1124_v7  ;;  %vm1234_vm15 = vc.u32 %v1226_v36, %v1230_v15 }
 0x111   :  { %v1248_v0 = vmul.u32 %v1246_v9, %v1222_v18  ;;  %v1235_v19 = vsel %vm1234_vm15, 1, %v4819_v63  ;;  %v1236_v28 = vadd.s32 %v1230_v15, %v1226_v36  ;;  %v1249_v3 = vmul.u32 %v1247_v5, %v1222_v18 }
 0x112   :  { %v1250_v21 = vmul.u32 %v1246_v9, %v1223_v49  ;;  %v982_v16 = vor.u32 4788187, %v981_v13  ;;  %v1231_v4 = vshrl.u32 %v1227_v26, 16  ;;  %v1237_v59 = vadd.s32 %v1235_v19, %v1229_v44 }
 0x113   :  { %v1331_v62 = vshrl.u32 %v1330_v41, 23  ;;  %vm1238_vm0 = vc.u32 %v1236_v28, %v1232_v52  ;;  %v1251_v10 = vmul.u32 %v1247_v5, %v1223_v49  ;;  %v1252_v42 = vshll.u32 %v1249_v3, 16 }
 0x114   :  { %v1254_v22 = vshll.u32 %v1250_v21, 16  ;;  %vm700_vm2 = vweird.f32 %v3188_v43  ;;  %v985_v32 = vcvt.s32.f32 %v978_v24  ;;  %v1189_v56 = vshrl.u32 %v4820_v40, %v3975_v29 }
 0x115   :  { %v1210_v15 = vsel %vm1208_vm6, %v4014_v58, 2102212464  ;;  %v1239_v9 = vsel %vm1238_vm0, 1, %v4819_v63  ;;  %v2994_v36 = vadd.s32 4294967294, %v1125_v55  ;;  %vm1256_vm13 = vc.u32 %v1248_v0, %v1252_v42 }
 0x116   :  { %v1241_v18 = vadd.s32 %v1239_v9, %v1237_v59  ;;  %v1258_v26 = vadd.s32 %v1252_v42, %v1248_v0  ;;  %v983_v52 = vand.u32 2147483647, %v982_v16  ;;  %v1233_v5 = vshrl.u32 %v1228_v23, 16 }
 0x117   :  { %v1257_v49 = vsel %vm1256_vm13, 1, %v4819_v63  ;;  %v2999_v12 = vadd.s32 4294967169, %v1331_v62  ;;  %v1253_v24 = vshrl.u32 %v1249_v3, 16  ;;  %v1209_v29 = vsel %vm1205_vm5, %v1189_v56, %v4038_v37 }
 0x118   :  { %v1242_v14 = vadd.s32 %v1241_v18, %v1231_v4  ;;  %v1259_v38 = vadd.s32 %v1257_v49, %v1251_v10  ;;  %vm1260_vm4 = vc.u32 %v1258_v26, %v1254_v22  ;;  %v1211_v58 = vsel %vm1207_vm9, %v4012_v34, %v1210_v15 }
 0x119   :  { %v1261_v7 = vsel %vm1260_vm4, 1, %v4819_v63  ;;  %v1337_v0 = vadd.s32 1, %v2999_v12  ;;  %v842_v23 = vmul.f32 %v841_v6, %v4065_v47  ;;  %vm867_vm6 = vcmp.lt.s32.totalorder %v3192_v46, 0 }
 0x11a   :  { %vm2995_vm7 = vcmp.lt.s32.totalorder %v2994_v36, 0  ;;  %v1255_v13 = vshrl.u32 %v1250_v21, 16  ;;  %v1263_v3 = vadd.s32 %v1261_v7, %v1259_v38  ;;  %v849_v10 = vmul.f32 %v848_v20, %v4065_v47 }
 0x11b   :  { %v4132_v44 = vadd.s32 %v1242_v14, %v1233_v5  ;;  %v4134_v41 = vadd.s32 %v1258_v26, %v1254_v22  ;;  %vm1338_vm5 = vcmp.gt.s32.totalorder %v1337_v0, 0  ;;  %v986_v37 = vmul.f32 %v985_v32, %v983_v52 }
 0x11c   :  { %v1212_v34 = vsel %vm1206_vm11, %v1209_v29, %v1211_v58  ;;  %v1264_v55 = vadd.s32 %v1263_v3, %v1253_v24  ;;  %v1339_v19 = vsel %vm1338_vm5, %v1337_v0, 0  ;;  %v4140_v6 = vsel %vm3971_vm3, 0, %v836_v48 }
 0x11d   :  { %v1128_v28 = vsel %vm2995_vm7, 0, %v2994_v36  ;;  %v4799_v21 = vand.u32 2147483647, %v4856_v27  ;;  %v1341_v16 = vand.u32 31, %v1339_v19  ;;  %v4145_v20 = vsel %vm700_vm2, nan, %v709_v30 }
 0x11e   :  { %4857 = vst [vmem:[#allocation15_spill] sm:$0xff] %v4145_v20  ;;  %v843_v4 = vadd.f32 -0.4999988, %v842_v23  ;;  %v4148_v59 = vand.u32 3, %v4140_v6  ;;  %v1265_v31 = vadd.s32 %v1264_v55, %v1255_v13  ;;  %v850_v62 = vadd.f32 -0.16666654, %v849_v10 }
 0x11f   :  { %v4858_v42 = vand.u32 2147483647, %v3192_v46  ;;  %v1266_v48 = vmul.u32 %v4030_v61, %v1212_v34  ;;  %vm1268_vm3 = vc.u32 %v4132_v44, %v4134_v41  ;;  %v4159_v22 = vsub.s32 32, %v1341_v16 }
 0x120   :  { %v987_v30 = vxor.u32 2147483648, %v986_v37  ;;  %v989_v32 = vsub.s32 4, %v3891_v17  ;;  %v1133_v56 = vsub.s32 4294967266, %v1128_v28  ;;  %v1269_v15 = vadd.s32 1, %v1265_v31 }
 0x121   :  { %vm4152_vm14 = vcmp.le.f32.partialorder %v4858_v42, 0.7853982  ;;  %v1334_v9 = vand.u32 8388607, %v4799_v21  ;;  %v4164_v36 = vshrl.u32 %v1339_v19, 5  ;;  %v1344_v18 = vshll.u32 %v4820_v40, %v1341_v16 }
 0x122   :  { %v1347_v26 = vshll.u32 %v4822_v60, %v1341_v16  ;;  %v1270_v61 = vsel %vm1268_vm3, %v1269_v15, %v1265_v31  ;;  %v1345_v52 = vshrl.u32 %v4822_v60, %v4159_v22  ;;  %v1353_v5 = vshll.u32 %v4824_v53, %v1341_v16 }
 0x123   :  { %v1354_v49 = vshrl.u32 %v4825_v25, %v4159_v22  ;;  %v1271_v12 = vadd.s32 %v1270_v61, %v1266_v48  ;;  %v1348_v14 = vshrl.u32 %v4823_v1, %v4159_v22  ;;  %v1350_v24 = vshll.u32 %v4823_v1, %v1341_v16 }
 0x124   :  { %v1351_v38 = vshrl.u32 %v4824_v53, %v4159_v22  ;;  %v1113_v29 = vadd.s32 %v3949_v39, %v3947_v57  ;;  %v1129_v58 = vsub.s32 32, %v1128_v28  ;;  %v1134_v7 = vadd.s32 127, %v1133_v56 }
 0x125   :  { %v1356_v0 = vshll.u32 %v4825_v25, %v1341_v16  ;;  %v851_v23 = vmul.f32 %v850_v62, %v4065_v47  ;;  %v988_v13 = vsel %vm867_vm6, %v987_v30, %v986_v37  ;;  %v1130_v3 = vshll.u32 %v4056_v11, %v1128_v28 }
 0x126   :  { %v1272_v10 = vadd.s32 536870912, %v1271_v12  ;;  %v1335_v34 = vor.u32 8388608, %v1334_v9  ;;  %v4185_v55 = vor.u32 %v1345_v52, %v1344_v18  ;;  %v1355_v19 = vor.u32 %v1354_v49, %v1353_v5 }
 0x127   :  { %v1357_v31 = vshrl.u32 %v4815_v33, %v4159_v22  ;;  %v4191_v39 = vor.u32 %v1348_v14, %v1347_v26  ;;  %v4193_v16 = vor.u32 %v1351_v38, %v1350_v24  ;;  %vm1362_vm1 = vcmp.lt.s32.totalorder %v4164_v36, 4 }
 0x128   :  { %v4189_v57 = vshrl.u32 %v1272_v10, 30  ;;  %v1131_v62 = vshrl.u32 %v1113_v29, %v1129_v58  ;;  %v1135_v37 = vshll.u32 %v1134_v7, 23  ;;  %vm1359_vm9 = vcmp.lt.s32.totalorder %v4164_v36, 1 }
 0x129   :  { %v1358_v42 = vor.u32 %v1357_v31, %v1356_v0  ;;  %v844_v11 = vmul.f32 %v843_v4, %v4065_v47  ;;  %v852_v28 = vadd.f32 1.0, %v851_v23  ;;  %vm1361_vm10 = vcmp.lt.s32.totalorder %v4164_v36, 3 }
 0x12a   :  { %v1274_v48 = vshll.u32 %v4189_v57, 30  ;;  %v4203_v30 = vsel %vm4152_vm14, %v3192_v46, %v988_v13  ;;  %v1368_v56 = vsel %vm1362_vm1, %v1355_v19, 920167782  ;;  %v4209_v9 = vshll.u32 %v1335_v34, 8 }
 0x12b   :  { %v1372_v15 = vsel %vm1362_vm1, %v1358_v42, 1326507024  ;;  %vm1360_vm11 = vcmp.lt.s32.totalorder %v4164_v36, 2  ;;  %v1367_v47 = vsel %vm1359_vm9, %v4185_v55, %v4191_v39  ;;  %v1371_v4 = vsel %vm1359_vm9, %v4191_v39, %v4193_v16 }
 0x12c   :  { %v4211_v18 = vsub.s32 %v1271_v12, %v1274_v48  ;;  %v1132_v26 = vor.u32 %v1131_v62, %v1130_v3  ;;  %v1136_v61 = vor.u32 4788187, %v1135_v37  ;;  %v1369_v52 = vsel %vm1361_vm10, %v4193_v16, %v1368_v56  ;;  %v4863_v62 = vld [vmem:[#allocation16_spill] sm:$0xff] }
 0x12d   :  { %v1373_v5 = vsel %vm1361_vm10, %v1355_v19, %v1372_v15  ;;  %v4229_v49 = vmul.f32 %v4203_v30, %v4203_v30  ;;  %v1377_v14 = vshrl.u32 %v4209_v9, 16  ;;  %v4237_v24 = vsel %vm867_vm6, %v989_v32, %v3891_v17 }
 0x12e   :  { %vm1276_vm12 = vcmp.lt.s32.totalorder %v4211_v18, 0  ;;  %v1277_v12 = vsub.s32 0, %v4211_v18  ;;  %v1370_v38 = vsel %vm1360_vm11, %v1367_v47, %v1369_v52  ;;  %v1374_v29 = vsel %vm1360_vm11, %v1371_v4, %v1373_v5 }
 0x12f   :  { %v1376_v58 = vand.u32 65535, %v4209_v9  ;;  %v4244_v7 = vadd.f32 1.0, %v844_v11  ;;  %v994_v0 = vmul.f32 -0.001358992, %v4229_v49  ;;  %v1378_v13 = vand.u32 65535, %v1374_v29 }
 0x130   :  { %v1278_v23 = vsel %vm1276_vm12, %v1277_v12, %v4211_v18  ;;  %v1137_v3 = vand.u32 2147483647, %v1136_v61  ;;  %v1139_v10 = vcvt.s32.f32 %v1132_v26  ;;  %v1379_v17 = vshrl.u32 %v1374_v29, 16 }
 0x131   :  { %4861 = vst [vmem:[#allocation28_spill] sm:$0xff] %v4244_v7  ;;  %v1279_v34 = vclz %v1278_v23  ;;  %v4249_v32 = vmul.f32 %v852_v28, %v4035_v54  ;;  %v4251_v19 = vmul.u32 %v1378_v13, %v1377_v14  ;;  %v1401_v31 = vshrl.u32 %v1370_v38, 16 }
 0x132   :  { %v1484_v37 = vand.u32 2139095040, %v4863_v62  ;;  %v1343_v11 = vshrl.u32 %v4820_v40, %v4159_v22  ;;  %v1381_v48 = vmul.u32 %v1379_v17, %v1376_v58  ;;  %v1400_v56 = vand.u32 65535, %v1370_v38 }
 0x133   :  { %4862 = vst [vmem:[#allocation29_spill] sm:$0xff] %v4249_v32  ;;  %v2997_v42 = vadd.s32 4294967294, %v1279_v34  ;;  %v995_v47 = vadd.f32 0.041655596, %v994_v0  ;;  %v1001_v4 = vmul.f32 -0.00019511016, %v4229_v49  ;;  %v1380_v26 = vmul.u32 %v1378_v13, %v1376_v58 }
 0x134   :  { %v1140_v61 = vmul.f32 %v1139_v10, %v1137_v3  ;;  %v1267_v54 = vadd.s32 %v4134_v41, %v4132_v44  ;;  %v1384_v28 = vshll.u32 %v1381_v48, 16  ;;  %v1383_v5 = vmul.u32 %v1379_v17, %v1377_v14  ;;  %v4864_v34 = vld [vmem:[#allocation13_spill] sm:$0xff] }
 0x135   :  { %vm2998_vm15 = vcmp.lt.s32.totalorder %v2997_v42, 0  ;;  %v1386_v12 = vshll.u32 %v4251_v19, 16  ;;  %v1403_v29 = vmul.u32 %v1401_v31, %v1376_v58  ;;  %v1363_v38 = vsel %vm1359_vm9, %v1343_v11, %v4185_v55 }
 0x136   :  { %v1282_v52 = vsel %vm2998_vm15, 0, %v2997_v42  ;;  %v1404_v0 = vmul.u32 %v1400_v56, %v1377_v14  ;;  %v1485_v23 = vshrl.u32 %v1484_v37, 23  ;;  %vm1021_vm0 = vcmp.lt.s32.totalorder %v4864_v34, 0 }
 0x137   :  { %v1287_v22 = vsub.s32 4294967266, %v1282_v52  ;;  %v1364_v44 = vsel %vm1362_vm1, %v4193_v16, 2102212464  ;;  %vm1388_vm13 = vc.u32 %v1380_v26, %v1384_v28  ;;  %v1390_v41 = vadd.s32 %v1384_v28, %v1380_v26 }
 0x138   :  { %v1402_v13 = vmul.u32 %v1400_v56, %v1376_v58  ;;  %vm857_vm4 = vcmp.eq.s32.totalorder %v4148_v59, 0  ;;  %vm860_vm6 = vcmp.eq.s32.totalorder %v4148_v59, 2  ;;  %v1283_v3 = vsub.s32 32, %v1282_v52 }
 0x139   :  { %v1385_v10 = vshrl.u32 %v1381_v48, 16  ;;  %v1389_v17 = vsel %vm1388_vm13, 1, %v4819_v63  ;;  %v1405_v55 = vmul.u32 %v1401_v31, %v1377_v14  ;;  %v1288_v42 = vadd.s32 127, %v1287_v22 }
 0x13a   :  { %v1391_v37 = vadd.s32 %v1389_v17, %v1383_v5  ;;  %vm1392_vm7 = vc.u32 %v1390_v41, %v1386_v12  ;;  %v1406_v11 = vshll.u32 %v1403_v29, 16  ;;  %v4865_v21 = vand.u32 2147483647, %v4864_v34 }
 0x13b   :  { %v1365_v58 = vsel %vm1361_vm10, %v4191_v39, %v1364_v44  ;;  %v1393_v56 = vsel %vm1392_vm7, 1, %v4819_v63  ;;  %v1408_v48 = vshll.u32 %v1404_v0, 16  ;;  %v3002_v26 = vadd.s32 4294967169, %v1485_v23 }
 0x13c   :  { %vm4273_vm5 = vcmp.le.f32.partialorder %v4865_v21, 0.7853982  ;;  %v1387_v14 = vshrl.u32 %v4251_v19, 16  ;;  %v1395_v31 = vadd.s32 %v1393_v56, %v1391_v37  ;;  %vm1410_vm3 = vc.u32 %v1402_v13, %v1406_v11 }
 0x13d   :  { %v1412_v28 = vadd.s32 %v1406_v11, %v1402_v13  ;;  %v1284_v5 = vshll.u32 %v4211_v18, %v1282_v52  ;;  %v1285_v12 = vshrl.u32 %v1267_v54, %v1283_v3  ;;  %v1407_v21 = vshrl.u32 %v1403_v29, 16 }
 0x13e   :  { %v1411_v22 = vsel %vm1410_vm3, 1, %v4819_v63  ;;  %v1289_v41 = vshll.u32 %v1288_v42, 23  ;;  %v1396_v17 = vadd.s32 %v1395_v31, %v1385_v10  ;;  %v4801_v39 = vxor.u32 2147483648, %v4249_v32 }
 0x13f   :  { %v1413_v15 = vadd.s32 %v1411_v22, %v1405_v55  ;;  %vm1414_vm1 = vc.u32 %v1412_v28, %v1408_v48  ;;  %v1141_v44 = vxor.u32 2147483648, %v1140_v61  ;;  %v1491_v43 = vadd.s32 1, %v3002_v26 }
 0x140   :  { %v1415_v23 = vsel %vm1414_vm1, 1, %v4819_v63  ;;  %v996_v19 = vmul.f32 %v995_v47, %v4229_v49  ;;  %v1002_v37 = vadd.f32 0.008332121, %v1001_v4  ;;  %v1409_v13 = vshrl.u32 %v1404_v0, 16 }
 0x141   :  { %v1417_v11 = vadd.s32 %v1415_v23, %v1413_v15  ;;  %v1366_v18 = vsel %vm1360_vm11, %v1363_v38, %v1365_v58  ;;  %v4289_v54 = vadd.s32 %v1396_v17, %v1387_v14  ;;  %v4291_v52 = vadd.s32 %v1412_v28, %v1408_v48 }
 0x142   :  { %vm1492_vm9 = vcmp.gt.s32.totalorder %v1491_v43, 0  ;;  %v1286_v29 = vor.u32 %v1285_v12, %v1284_v5  ;;  %v1290_v3 = vor.u32 4788187, %v1289_v41  ;;  %v4296_v42 = vsel %vm4152_vm14, 0, %v4237_v24 }
 0x143   :  { %v1418_v10 = vadd.s32 %v1417_v11, %v1407_v21  ;;  %v1493_v55 = vsel %vm1492_vm9, %v1491_v43, 0  ;;  %4868 = vst [vmem:[#allocation16_spill] sm:$0xff] %v4296_v42  ;;  %v1142_v15 = vsel %vm1021_vm0, %v1141_v44, %v1140_v61  ;;  %v4802_v36 = vand.u32 2147483647, %v4863_v62 }
 0x144   :  { %v1495_v47 = vand.u32 31, %v1493_v55  ;;  %v4306_v4 = vsel %vm857_vm4, %v4244_v7, %v4801_v39  ;;  %v4869_v43 = vxor.u32 2147483648, %v4244_v7  ;;  %v1003_v24 = vmul.f32 %v1002_v37, %v4229_v49 }
 0x145   :  { %v1419_v61 = vadd.s32 %v1418_v10, %v1409_v13  ;;  %v997_v38 = vadd.f32 -0.4999988, %v996_v19  ;;  %v1420_v0 = vmul.u32 %v4209_v9, %v1366_v18  ;;  %vm1422_vm14 = vc.u32 %v4289_v54, %v4291_v52 }
 0x146   :  { %v4313_v51 = vsel %vm860_vm6, %v4869_v43, %v4249_v32  ;;  %v4319_v58 = vsub.s32 32, %v1495_v47  ;;  %v4324_v56 = vsel %vm4273_vm5, %v4864_v34, %v1142_v15  ;;  %v1291_v48 = vand.u32 2147483647, %v1290_v3 }
 0x147   :  { %v1293_v26 = vcvt.s32.f32 %v1286_v29  ;;  %v1423_v14 = vadd.s32 1, %v1419_v61  ;;  %vm1175_vm10 = vcmp.lt.s32.totalorder %v4844_v35, 0  ;;  %v1488_v31 = vand.u32 8388607, %v4802_v36 }
 0x148   :  { %v4329_v28 = vshrl.u32 %v1493_v55, 5  ;;  %v1498_v9 = vshll.u32 %v4820_v40, %v1495_v47  ;;  %v1501_v5 = vshll.u32 %v4822_v60, %v1495_v47  ;;  %v1499_v21 = vshrl.u32 %v4822_v60, %v4319_v58 }
 0x149   :  { %v1424_v12 = vsel %vm1422_vm14, %v1423_v14, %v1419_v61  ;;  %v1507_v22 = vshll.u32 %v4824_v53, %v1495_v47  ;;  %v1508_v41 = vshrl.u32 %v4825_v25, %v4319_v58  ;;  %v1502_v44 = vshrl.u32 %v4823_v1, %v4319_v58 }
 0x14a   :  { %v1425_v17 = vadd.s32 %v1424_v12, %v1420_v0  ;;  %v1504_v23 = vshll.u32 %v4823_v1, %v1495_v47  ;;  %v1505_v19 = vshrl.u32 %v4824_v53, %v4319_v58  ;;  %v1004_v37 = vadd.f32 -0.16666654, %v1003_v24 }
 0x14b   :  { %v4870_v13 = vand.u32 2147483647, %v4844_v35  ;;  %v1294_v60 = vmul.f32 %v1293_v26, %v1291_v48  ;;  %v1510_v18 = vshll.u32 %v4825_v25, %v1495_v47  ;;  %v998_v29 = vmul.f32 %v997_v38, %v4229_v49 }
 0x14c   :  { %v1143_v3 = vsub.s32 4, %v4007_v45  ;;  %v4354_v1 = vmul.f32 %v4324_v56, %v4324_v56  ;;  %v1426_v10 = vadd.s32 536870912, %v1425_v17  ;;  %v1489_v53 = vor.u32 8388608, %v1488_v31 }
 0x14d   :  { %vm4345_vm11 = vcmp.le.f32.partialorder %v4870_v13, 0.7853982  ;;  %v4356_v55 = vor.u32 %v1499_v21, %v1498_v9  ;;  %v1509_v15 = vor.u32 %v1508_v41, %v1507_v22  ;;  %v1511_v43 = vshrl.u32 %v4815_v33, %v4319_v58 }
 0x14e   :  { %v4360_v24 = vshrl.u32 %v1426_v10, 30  ;;  %v4362_v61 = vor.u32 %v1502_v44, %v1501_v5  ;;  %v4364_v25 = vor.u32 %v1505_v19, %v1504_v23  ;;  %vm1516_vm12 = vcmp.lt.s32.totalorder %v4329_v28, 4 }
 0x14f   :  { %v1005_v47 = vmul.f32 %v1004_v37, %v4229_v49  ;;  %v1295_v38 = vxor.u32 2147483648, %v1294_v60  ;;  %v1512_v0 = vor.u32 %v1511_v43, %v1510_v18  ;;  %vm1513_vm15 = vcmp.lt.s32.totalorder %v4329_v28, 1 }
 0x150   :  { %v1148_v48 = vmul.f32 -0.001358992, %v4354_v1  ;;  %v1155_v26 = vmul.f32 -0.00019511016, %v4354_v1  ;;  %v1428_v33 = vshll.u32 %v4360_v24, 30  ;;  %vm1515_vm13 = vcmp.lt.s32.totalorder %v4329_v28, 3 }
 0x151   :  { %v1144_v14 = vsel %vm1021_vm0, %v1143_v3, %v4007_v45  ;;  %v1522_v31 = vsel %vm1516_vm12, %v1509_v15, 920167782  ;;  %v1526_v49 = vsel %vm1516_vm12, %v1512_v0, 1326507024  ;;  %v4380_v9 = vshll.u32 %v1489_v53, 8 }
 0x152   :  { %v4382_v5 = vsub.s32 %v1425_v17, %v1428_v33  ;;  %vm1514_vm4 = vcmp.lt.s32.totalorder %v4329_v28, 2  ;;  %v1521_v12 = vsel %vm1513_vm15, %v4356_v55, %v4362_v61  ;;  %v1525_v45 = vsel %vm1513_vm15, %v4362_v61, %v4364_v25 }
 0x153   :  { %v4393_v21 = vadd.f32 1.0, %v998_v29  ;;  %v1296_v22 = vsel %vm1175_vm10, %v1295_v38, %v1294_v60  ;;  %v1523_v41 = vsel %vm1515_vm13, %v4364_v25, %v1522_v31  ;;  %v1527_v17 = vsel %vm1515_vm13, %v1509_v15, %v1526_v49 }
 0x154   :  { %v1006_v44 = vadd.f32 1.0, %v1005_v47  ;;  %vm1430_vm0 = vcmp.lt.s32.totalorder %v4382_v5, 0  ;;  %v1431_v23 = vsub.s32 0, %v4382_v5  ;;  %v1531_v19 = vshrl.u32 %v4380_v9, 16 }
 0x155   :  { %v1149_v37 = vadd.f32 0.041655596, %v1148_v48  ;;  %v1524_v13 = vsel %vm1514_vm4, %v1521_v12, %v1523_v41  ;;  %v1528_v60 = vsel %vm1514_vm4, %v1525_v45, %v1527_v17  ;;  %v1530_v18 = vand.u32 65535, %v4380_v9 }
 0x156   :  { %v1156_v29 = vadd.f32 0.008332121, %v1155_v26  ;;  %v4413_v3 = vsel %vm4345_vm11, %v4844_v35, %v1296_v22  ;;  %v1432_v10 = vsel %vm1430_vm0, %v1431_v23, %v4382_v5  ;;  %v1532_v53 = vand.u32 65535, %v1528_v60 }
 0x157   :  { %v4417_v15 = vand.u32 3, %v4296_v42  ;;  %v4421_v43 = vsel %vm4273_vm5, 0, %v1144_v14  ;;  %v1433_v47 = vclz %v1432_v10  ;;  %v1533_v38 = vshrl.u32 %v1528_v60, 16 }
 0x158   :  { %v4424_v0 = vmul.f32 %v1006_v44, %v4203_v30  ;;  %v4427_v26 = vmul.u32 %v1532_v53, %v1531_v19  ;;  %v1555_v33 = vshrl.u32 %v1524_v13, 16  ;;  %v1150_v31 = vmul.f32 %v1149_v37, %v4354_v1 }
 0x159   :  { %v4432_v49 = vmul.f32 %v4413_v3, %v4413_v3  ;;  %v3000_v12 = vadd.s32 4294967294, %v1433_v47  ;;  %v1535_v16 = vmul.u32 %v1533_v38, %v1530_v18  ;;  %v1157_v14 = vmul.f32 %v1156_v29, %v4354_v1 }
 0x15a   :  { %v1421_v45 = vadd.s32 %v4291_v52, %v4289_v54  ;;  %v1534_v30 = vmul.u32 %v1532_v53, %v1530_v18  ;;  %v1554_v22 = vand.u32 65535, %v1524_v13  ;;  %v1497_v17 = vshrl.u32 %v4820_v40, %v4319_v58 }
 0x15b   :  { %v1302_v41 = vmul.f32 -0.001358992, %v4432_v49  ;;  %vm3001_vm6 = vcmp.lt.s32.totalorder %v3000_v12, 0  ;;  %v1537_v44 = vmul.u32 %v1533_v38, %v1531_v19  ;;  %v1538_v37 = vshll.u32 %v1535_v16, 16 }
 0x15c   :  { %v1436_v23 = vsel %vm3001_vm6, 0, %v3000_v12  ;;  %v1540_v60 = vshll.u32 %v4427_v26, 16  ;;  %v1557_v10 = vmul.u32 %v1555_v33, %v1530_v18  ;;  %v1309_v47 = vmul.f32 -0.00019511016, %v4432_v49 }
 0x15d   :  { %v1437_v29 = vsub.s32 32, %v1436_v23  ;;  %v1438_v39 = vshll.u32 %v4382_v5, %v1436_v23  ;;  %v1441_v54 = vsub.s32 4294967266, %v1436_v23  ;;  %vm1542_vm7 = vc.u32 %v1534_v30, %v1538_v37 }
 0x15e   :  { %v1544_v52 = vadd.s32 %v1538_v37, %v1534_v30  ;;  %v1556_v13 = vmul.u32 %v1554_v22, %v1530_v18  ;;  %v1558_v53 = vmul.u32 %v1554_v22, %v1531_v19  ;;  %vm1014_vm5 = vcmp.eq.s32.totalorder %v4417_v15, 2 }
 0x15f   :  { %v1439_v36 = vshrl.u32 %v1421_v45, %v1437_v29  ;;  %v1442_v40 = vadd.s32 127, %v1441_v54  ;;  %v1539_v58 = vshrl.u32 %v1535_v16, 16  ;;  %v1543_v38 = vsel %vm1542_vm7, 1, %v4819_v63 }
 0x160   :  { %v1545_v12 = vadd.s32 %v1543_v38, %v1537_v44  ;;  %vm1546_vm3 = vc.u32 %v1544_v52, %v1540_v60  ;;  %v1559_v48 = vmul.u32 %v1555_v33, %v1531_v19  ;;  %v1560_v42 = vshll.u32 %v1557_v10, 16 }
 0x161   :  { %v1310_v7 = vadd.f32 0.008332121, %v1309_v47  ;;  %v1440_v32 = vor.u32 %v1439_v36, %v1438_v39  ;;  %v1443_v20 = vshll.u32 %v1442_v40, 23  ;;  %v1547_v5 = vsel %vm1546_vm3, 1, %v4819_v63 }
 0x162   :  { %vm1011_vm1 = vcmp.eq.s32.totalorder %v4417_v15, 0  ;;  %v1518_v18 = vsel %vm1516_vm12, %v4364_v25, 2102212464  ;;  %v1549_v45 = vadd.s32 %v1547_v5, %v1545_v12  ;;  %v1562_v30 = vshll.u32 %v1558_v53, 16 }
 0x163   :  { %vm1564_vm9 = vc.u32 %v1556_v13, %v1560_v42  ;;  %vm856_vm14 = vcmp.lt.s32.totalorder %v4148_v59, 2  ;;  %v1444_v16 = vor.u32 4788187, %v1443_v20  ;;  %v1447_v22 = vcvt.s32.f32 %v1440_v32 }
 0x164   :  { %v1565_v19 = vsel %vm1564_vm9, 1, %v4819_v63  ;;  %v1566_v33 = vadd.s32 %v1560_v42, %v1556_v13  ;;  %v1158_v39 = vadd.f32 -0.16666654, %v1157_v14  ;;  %v1541_v36 = vshrl.u32 %v4427_v26, 16 }
 0x165   :  { %v1550_v44 = vadd.s32 %v1549_v45, %v1539_v58  ;;  %v1567_v23 = vadd.s32 %v1565_v19, %v1559_v48  ;;  %vm1010_vm0 = vcmp.lt.s32.totalorder %v4417_v15, 2  ;;  %v1151_v37 = vadd.f32 -0.4999988, %v1150_v31 }
 0x166   :  { %v1445_v60 = vand.u32 2147483647, %v1444_v16  ;;  %v1561_v25 = vshrl.u32 %v1557_v10, 16  ;;  %vm1568_vm12 = vc.u32 %v1566_v33, %v1562_v30  ;;  %v1303_v47 = vadd.f32 0.041655596, %v1302_v41 }
 0x167   :  { %v1517_v20 = vsel %vm1513_vm15, %v1497_v17, %v4356_v55  ;;  %v1519_v32 = vsel %vm1515_vm13, %v4362_v61, %v1518_v18  ;;  %v1569_v42 = vsel %vm1568_vm12, 1, %v4819_v63  ;;  %v1311_v26 = vmul.f32 %v1310_v7, %v4432_v49 }
 0x168   :  { %v1448_v48 = vmul.f32 %v1447_v22, %v1445_v60  ;;  %v1563_v14 = vshrl.u32 %v1558_v53, 16  ;;  %v1571_v29 = vadd.s32 %v1569_v42, %v1567_v23  ;;  %v1159_v31 = vmul.f32 %v1158_v39, %v4354_v1 }
 0x169   :  { %vm1329_vm6 = vcmp.lt.s32.totalorder %v4856_v27, 0  ;;  %v4464_v41 = vadd.s32 %v1550_v44, %v1541_v36  ;;  %v4466_v10 = vadd.s32 %v1566_v33, %v1562_v30  ;;  %v4873_v55 = vand.u32 2147483647, %v4856_v27 }
 0x16a   :  { %v1449_v63 = vxor.u32 2147483648, %v1448_v48  ;;  %v1520_v7 = vsel %vm1514_vm4, %v1517_v20, %v1519_v32  ;;  %v1572_v61 = vadd.s32 %v1571_v29, %v1561_v25  ;;  %v1012_v54 = vxor.u32 2147483648, %v4424_v0 }
 0x16b   :  { %vm4470_vm15 = vcmp.le.f32.partialorder %v4873_v55, 0.7853982  ;;  %v4876_v52 = vxor.u32 2147483648, %v4393_v21  ;;  %v1152_v53 = vmul.f32 %v1151_v37, %v4354_v1  ;;  %v1304_v40 = vmul.f32 %v1303_v47, %v4432_v49 }
 0x16c   :  { %v1163_v58 = vand.u32 3, %v4421_v43  ;;  %v1312_v38 = vadd.f32 -0.16666654, %v1311_v26  ;;  %v1450_v28 = vsel %vm1329_vm6, %v1449_v63, %v1448_v48  ;;  %v1573_v12 = vadd.s32 %v1572_v61, %v1563_v14 }
 0x16d   :  { %v1016_v13 = vsel %vm1014_vm5, %v4876_v52, %v4424_v0  ;;  %v1160_v5 = vadd.f32 1.0, %v1159_v31  ;;  %v1453_v18 = vsel %vm4470_vm15, %v4856_v27, %v1450_v28  ;;  %v1574_v45 = vmul.u32 %v4380_v9, %v1520_v7 }
 0x16e   :  { %vm1576_vm13 = vc.u32 %v4464_v41, %v4466_v10  ;;  %v1013_v1 = vsel %vm1011_vm1, %v4393_v21, %v1012_v54  ;;  %v1297_v30 = vsub.s32 4, %v4189_v57  ;;  %v1455_v16 = vmul.f32 %v1453_v18, %v1453_v18 }
 0x16f   :  { %v1577_v22 = vadd.s32 1, %v1573_v12  ;;  %v863_v19 = vsel %vm856_vm14, %v4306_v4, %v4313_v51  ;;  %v4503_v33 = vadd.f32 1.0, %v1152_v53  ;;  %v1305_v9 = vadd.f32 -0.4999988, %v1304_v40 }
 0x170   :  { %v1451_v39 = vsub.s32 4, %v4360_v24  ;;  %vm854_vm4 = vweird.f32 %v4847_v50  ;;  %v1313_v36 = vmul.f32 %v1312_v38, %v4432_v49  ;;  %v1456_v44 = vmul.f32 -0.001358992, %v1455_v16 }
 0x171   :  { %v1463_v23 = vmul.f32 -0.00019511016, %v1455_v16  ;;  %v1578_v37 = vsel %vm1576_vm13, %v1577_v22, %v1573_v12  ;;  %vm1008_vm7 = vweird.f32 %v3192_v46  ;;  %v1017_v60 = vsel %vm1010_vm0, %v1013_v1, %v1016_v13 }
 0x172   :  { %v4512_v59 = vmul.f32 %v1160_v5, %v4324_v56  ;;  %v1579_v4 = vadd.s32 %v1578_v37, %v1574_v45  ;;  %vm1165_vm5 = vcmp.eq.s32.totalorder %v1163_v58, 0  ;;  %v1298_v51 = vsel %vm1175_vm10, %v1297_v30, %v4189_v57 }
 0x173   :  { %v1457_v25 = vadd.f32 0.041655596, %v1456_v44  ;;  %v1464_v47 = vadd.f32 0.008332121, %v1463_v23  ;;  %vm1168_vm3 = vcmp.eq.s32.totalorder %v1163_v58, 2  ;;  %v1169_v20 = vxor.u32 2147483648, %v4503_v33 }
 0x174   :  { %v1306_v32 = vmul.f32 %v1305_v9, %v4432_v49  ;;  %v1580_v42 = vadd.s32 536870912, %v1579_v4  ;;  %v1314_v26 = vadd.f32 1.0, %v1313_v36  ;;  %v1452_v56 = vsel %vm1329_vm6, %v1451_v39, %v4360_v24 }
 0x175   :  { %v1458_v15 = vmul.f32 %v1457_v25, %v1455_v16  ;;  %v1465_v48 = vmul.f32 %v1464_v47, %v1455_v16  ;;  %vm1164_vm1 = vcmp.lt.s32.totalorder %v1163_v58, 2  ;;  %v1166_v14 = vxor.u32 2147483648, %v4512_v59  ;;  %v4880_v47 = vld [vmem:[#allocation25_spill] sm:$0xff] }
 0x176   :  { %v4525_v57 = vsel %vm4345_vm11, 0, %v1298_v51  ;;  %v1581_v29 = vshrl.u32 %v1580_v42, 30  ;;  %v1170_v49 = vsel %vm1168_vm3, %v1169_v20, %v4512_v59  ;;  %v4535_v7 = vadd.f32 1.0, %v1306_v32 }
 0x177   :  { %v1317_v31 = vand.u32 3, %v4525_v57  ;;  %v1459_v55 = vadd.f32 -0.4999988, %v1458_v15  ;;  %v1466_v63 = vadd.f32 -0.16666654, %v1465_v48  ;;  %v1167_v24 = vsel %vm1165_vm5, %v4503_v33, %v1166_v14 }
 0x178   :  { %v4539_v11 = vsel %vm4470_vm15, 0, %v1452_v56  ;;  %v1582_v61 = vshll.u32 %v1581_v29, 30  ;;  %v4542_v52 = vmul.f32 %v1314_v26, %v4413_v3  ;;  %v4547_v38 = vsel %vm854_vm4, nan, %v863_v19 }
 0x179   :  { %v1460_v13 = vmul.f32 %v1459_v55, %v1455_v16  ;;  %v1467_v53 = vmul.f32 %v1466_v63, %v1455_v16  ;;  %v1471_v40 = vand.u32 3, %v4539_v11  ;;  %v4551_v28 = vsel %vm1008_vm7, nan, %v1017_v60 }
 0x17a   :  { %vm1162_vm10 = vweird.f32 %v4864_v34  ;;  %v1583_v17 = vsub.s32 %v1579_v4, %v1582_v61  ;;  %v1171_v12 = vsel %vm1164_vm1, %v1167_v24, %v1170_v49  ;;  %vm1322_vm11 = vcmp.eq.s32.totalorder %v1317_v31, 2 }
 0x17b   :  { %v4555_v3 = vadd.f32 1.0, %v1460_v13  ;;  %v1468_v5 = vadd.f32 1.0, %v1467_v53  ;;  %vm1319_vm9 = vcmp.eq.s32.totalorder %v1317_v31, 0  ;;  %v1323_v45 = vxor.u32 2147483648, %v4535_v7 }
 0x17c   :  { %vm1584_vm14 = vcmp.lt.s32.totalorder %v1583_v17, 0  ;;  %v1585_v1 = vsub.s32 0, %v1583_v17  ;;  %vm1318_vm0 = vcmp.lt.s32.totalorder %v1317_v31, 2  ;;  %v1320_v30 = vxor.u32 2147483648, %v4542_v52 }
 0x17d   :  { %v4559_v16 = vmul.f32 %v1468_v5, %v1453_v18  ;;  %vm1476_vm12 = vcmp.eq.s32.totalorder %v1471_v40, 2  ;;  %v1324_v58 = vsel %vm1322_vm11, %v1323_v45, %v4542_v52  ;;  %vm1473_vm6 = vcmp.eq.s32.totalorder %v1471_v40, 0 }
 0x17e   :  { %v1477_v22 = vxor.u32 2147483648, %v4555_v3  ;;  %v1586_v19 = vsel %vm1584_vm14, %v1585_v1, %v1583_v17  ;;  %v1321_v9 = vsel %vm1319_vm9, %v4535_v7, %v1320_v30  ;;  %v1605_v44 = vsub.s32 4, %v1581_v29 }
 0x17f   :  { %v1474_v39 = vxor.u32 2147483648, %v4559_v16  ;;  %v1587_v36 = vclz %v1586_v19  ;;  %v1172_v18 = vsel %vm1162_vm10, nan, %v1171_v12  ;;  %vm1316_vm15 = vweird.f32 %v4844_v35  ;;  %v4904_v35 = vld [vmem:[#allocation24_spill] sm:$0xff] }
 0x180   :  { %vm1472_vm13 = vcmp.lt.s32.totalorder %v1471_v40, 2  ;;  %v1478_v23 = vsel %vm1476_vm12, %v1477_v22, %v4559_v16  ;;  %v4877_v60 = vand.u32 2147483647, %v4863_v62  ;;  %vm1483_vm3 = vcmp.lt.s32.totalorder %v4863_v62, 0  ;;  %v4882_v40 = vld [vmem:[#allocation14_spill] sm:$0xff] }
 0x181   :  { %v1475_v37 = vsel %vm1473_vm6, %v4555_v3, %v1474_v39  ;;  %v3003_v51 = vadd.s32 4294967294, %v1587_v36  ;;  %v1325_v25 = vsel %vm1318_vm0, %v1321_v9, %v1324_v58  ;;  %vm1470_vm1 = vweird.f32 %v4856_v27  ;;  %v4884_v9 = vld [vmem:[#allocation12_spill] sm:$0xff] }
 0x182   :  { %vm4580_vm5 = vcmp.le.f32.partialorder %v4877_v60, 0.7853982  ;;  %v1787_v32 = vadd.s32 3, %v4880_v47  ;;  %v1942_v42 = vadd.s32 3, %v3960_v2  ;;  %v1479_v26 = vsel %vm1472_vm13, %v1475_v37, %v1478_v23  ;;  %v4887_v37 = vld [vmem:[#allocation18_spill] sm:$0xff]  ;;  %v4888_v60 = vld [vmem:[#allocation27_spill] sm:$0xff] }
 0x183   :  { %v1575_v56 = vadd.s32 %v4466_v10, %v4464_v41  ;;  %vm3004_vm11 = vcmp.lt.s32.totalorder %v3003_v51, 0  ;;  %v1606_v15 = vsel %vm1483_vm3, %v1605_v44, %v1581_v29  ;;  %v2097_v31 = vadd.s32 3, %v4140_v6  ;;  %v4886_v44 = vld [vmem:[#allocation17_spill] sm:$0xff]  ;;  %v4890_v47 = vld [vmem:[#allocation15_spill] sm:$0xff] }
 0x184   :  { %v1590_v48 = vsel %vm3004_vm11, 0, %v3003_v51  ;;  %v1788_v49 = vand.u32 3, %v1787_v32  ;;  %v1943_v55 = vand.u32 3, %v1942_v42  ;;  %v4596_v63 = vsel %vm1316_vm15, nan, %v1325_v25  ;;  %v4889_v25 = vld [vmem:[#allocation19_spill] sm:$0xff]  ;;  %v4891_v42 = vld [vmem:[#allocation20_spill] sm:$0xff] }
 0x185   :  { %v1591_v24 = vsub.s32 32, %v1590_v48  ;;  %v1592_v61 = vshll.u32 %v1583_v17, %v1590_v48  ;;  %v1595_v2 = vsub.s32 4294967266, %v1590_v48  ;;  %v1608_v13 = vsel %vm4580_vm5, 0, %v1606_v15 }
 0x186   :  { %vm1790_vm9 = vcmp.eq.s32.totalorder %v1788_v49, 0  ;;  %vm1793_vm14 = vcmp.eq.s32.totalorder %v1788_v49, 2  ;;  %vm1945_vm0 = vcmp.eq.s32.totalorder %v1943_v55, 0  ;;  %v4602_v41 = vsel %vm1470_vm1, nan, %v1479_v26 }
 0x187   :  { %v1593_v10 = vshrl.u32 %v1575_v56, %v1591_v24  ;;  %v1596_v29 = vadd.s32 127, %v1595_v2  ;;  %v4604_v6 = vand.u32 3, %v1608_v13  ;;  %vm1789_vm12 = vcmp.lt.s32.totalorder %v1788_v49, 2  ;;  %v4893_v49 = vld [vmem:[#allocation22_spill] sm:$0xff] }
 0x188   :  { %v4881_v53 = vxor.u32 2147483648, %v3952_v8  ;;  %v4883_v12 = vxor.u32 2147483648, %v4882_v40  ;;  %v2098_v1 = vand.u32 3, %v2097_v31  ;;  %vm1944_vm6 = vcmp.lt.s32.totalorder %v1943_v55, 2 }
 0x189   :  { %v1594_v58 = vor.u32 %v1593_v10, %v1592_v61  ;;  %v1597_v19 = vshll.u32 %v1596_v29, 23  ;;  %v4885_v36 = vxor.u32 2147483648, %v4884_v9  ;;  %v4617_v51 = vmul.f32 %v4888_v60, %v4887_v37 }
 0x18a   :  { %v1792_v17 = vsel %vm1790_vm9, %v4882_v40, %v4881_v53  ;;  %v1795_v5 = vsel %vm1793_vm14, %v4883_v12, %v3952_v8  ;;  %v4621_v32 = vmul.f32 %v4890_v47, %v4889_v25  ;;  %v4625_v26 = vmul.f32 %v4547_v38, %v4891_v42  ;;  %v4892_v8 = vld [vmem:[#allocation21_spill] sm:$0xff]  ;;  %v4898_v40 = vld [vmem:[#allocation28_spill] sm:$0xff] }
 0x18b   :  { %v1947_v23 = vsel %vm1945_vm0, %v4886_v44, %v4885_v36  ;;  %v4629_v56 = vmul.f32 %v4551_v28, %v4892_v8  ;;  %v1598_v15 = vor.u32 4788187, %v1597_v19  ;;  %v1601_v48 = vcvt.s32.f32 %v1594_v58  ;;  %v4896_v53 = vld [vmem:[#allocation29_spill] sm:$0xff]  ;;  %v4900_v58 = vld [vmem:[#allocation16_spill] sm:$0xff] }
 0x18c   :  { %v4632_v31 = vmul.f32 %v1172_v18, %v4893_v49  ;;  %v1796_v24 = vsel %vm1789_vm12, %v1792_v17, %v1795_v5  ;;  %vm1948_vm13 = vcmp.eq.s32.totalorder %v1943_v55, 2  ;;  %vm2099_vm11 = vcmp.lt.s32.totalorder %v2098_v1, 2 }
 0x18d   :  { %v1797_v2 = vsel %vm546_vm8, nan, %v1796_v24  ;;  %vm2100_vm9 = vcmp.eq.s32.totalorder %v2098_v1, 0  ;;  %v1599_v10 = vand.u32 2147483647, %v1598_v15  ;;  %v4895_v38 = vxor.u32 2147483648, %v4886_v44 }
 0x18e   :  { %v4897_v28 = vxor.u32 2147483648, %v4896_v53  ;;  %vm2103_vm14 = vcmp.eq.s32.totalorder %v2098_v1, 2  ;;  %v4899_v17 = vxor.u32 2147483648, %v4898_v40  ;;  %v2252_v19 = vadd.s32 3, %v4900_v58 }
 0x18f   :  { %v1950_v29 = vsel %vm1948_vm13, %v4895_v38, %v4884_v9  ;;  %v2407_v36 = vadd.s32 3, %v4421_v43  ;;  %v1602_v60 = vmul.f32 %v1601_v48, %v1599_v10  ;;  %v2562_v15 = vadd.s32 3, %v4525_v57 }
 0x190   :  { %v2102_v12 = vsel %vm2100_vm9, %v4898_v40, %v4897_v28  ;;  %v1951_v18 = vsel %vm1944_vm6, %v1947_v23, %v1950_v29  ;;  %v2105_v5 = vsel %vm2103_vm14, %v4899_v17, %v4896_v53  ;;  %v2253_v55 = vand.u32 3, %v2252_v19 }
 0x191   :  { %v1952_v44 = vsel %vm700_vm2, nan, %v1951_v18  ;;  %v2106_v9 = vsel %vm2099_vm11, %v2102_v12, %v2105_v5  ;;  %v2408_v23 = vand.u32 3, %v2407_v36  ;;  %v2717_v24 = vadd.s32 3, %v4539_v11 }
 0x192   :  { %v2107_v1 = vsel %vm854_vm4, nan, %v2106_v9  ;;  %v1603_v61 = vxor.u32 2147483648, %v1602_v60  ;;  %v2563_v38 = vand.u32 3, %v2562_v15  ;;  %v2872_v29 = vadd.s32 3, %v1608_v13 }
 0x193   :  { %v4655_v53 = vmul.f32 %v1797_v2, %v4887_v37  ;;  %vm2254_vm8 = vcmp.lt.s32.totalorder %v2253_v55, 2  ;;  %vm2255_vm0 = vcmp.eq.s32.totalorder %v2253_v55, 0  ;;  %vm2258_vm12 = vcmp.eq.s32.totalorder %v2253_v55, 2 }
 0x194   :  { %vm2409_vm2 = vcmp.lt.s32.totalorder %v2408_v23, 2  ;;  %v1604_v43 = vsel %vm1483_vm3, %v1603_v61, %v1602_v60  ;;  %v2257_v50 = vsel %vm2255_vm0, %v4393_v21, %v1012_v54  ;;  %v4902_v57 = vxor.u32 2147483648, %v4393_v21 }
 0x195   :  { %vm2410_vm4 = vcmp.eq.s32.totalorder %v2408_v23, 0  ;;  %v4668_v13 = vsel %vm4580_vm5, %v4863_v62, %v1604_v43  ;;  %vm2413_vm3 = vcmp.eq.s32.totalorder %v2408_v23, 2  ;;  %vm2564_vm6 = vcmp.lt.s32.totalorder %v2563_v38, 2  ;;  %v2924_v23 = vld [vmem:[#allocation4] sm:$0xff] }
 0x196   :  { %v2260_v11 = vsel %vm2258_vm12, %v4902_v57, %v4424_v0  ;;  %v2412_v48 = vsel %vm2410_vm4, %v4503_v33, %v1166_v14  ;;  %v1609_v2 = vmul.f32 %v4668_v13, %v4668_v13  ;;  %v2415_v21 = vsel %vm2413_vm3, %v1169_v20, %v4512_v59 }
 0x197   :  { %v2261_v37 = vsel %vm2254_vm8, %v2257_v50, %v2260_v11  ;;  %v2416_v0 = vsel %vm2409_vm2, %v2412_v48, %v2415_v21  ;;  %vm2565_vm5 = vcmp.eq.s32.totalorder %v2563_v38, 0  ;;  %vm2568_vm13 = vcmp.eq.s32.totalorder %v2563_v38, 2  ;;  %v2925_v38 = vld [vmem:[#allocation4 + $0x8] sm:$0xff]  ;;  %v2928_v11 = vld [vmem:[#allocation4 + $0x20] sm:$0xff]  ;;  %v2930_v21 = vld [vmem:[#allocation4 + $0x30] sm:$0xff] }
 0x198   :  { %v2262_v54 = vsel %vm1008_vm7, nan, %v2261_v37  ;;  %v2718_v4 = vand.u32 3, %v2717_v24  ;;  %v1610_v10 = vmul.f32 -0.001358992, %v1609_v2  ;;  %v1617_v28 = vmul.f32 -0.00019511016, %v1609_v2 }
 0x199   :  { %v2417_v14 = vsel %vm1162_vm10, nan, %v2416_v0  ;;  %v2567_v40 = vsel %vm2565_vm5, %v4535_v7, %v1320_v30  ;;  %v2570_v46 = vsel %vm2568_vm13, %v1323_v45, %v4542_v52  ;;  %vm1630_vm10 = vcmp.eq.s32.totalorder %v4604_v6, 2  ;;  %v2929_v48 = vld [vmem:[#allocation4 + $0x28] sm:$0xff] }
 0x19a   :  { %vm2719_vm7 = vcmp.lt.s32.totalorder %v2718_v4, 2  ;;  %vm2720_vm11 = vcmp.eq.s32.totalorder %v2718_v4, 0  ;;  %vm2723_vm9 = vcmp.eq.s32.totalorder %v2718_v4, 2  ;;  %v1611_v33 = vadd.f32 0.041655596, %v1610_v10 }
 0x19b   :  { %v1618_v59 = vadd.f32 0.008332121, %v1617_v28  ;;  %v2571_v20 = vsel %vm2564_vm6, %v2567_v40, %v2570_v46  ;;  %v2722_v12 = vsel %vm2720_vm11, %v4555_v3, %v1474_v39  ;;  %v2725_v7 = vsel %vm2723_vm9, %v1477_v22, %v4559_v16  ;;  %v4903_v39 = vld [vmem:[#allocation23_spill] sm:$0xff] }
 0x19c   :  { %v2572_v34 = vsel %vm1316_vm15, nan, %v2571_v20  ;;  %v4697_v52 = vand.u32 3, %v2872_v29  ;;  %v2884_v45 = vmul.f32 %v1952_v44, %v4889_v25  ;;  %v1612_v30 = vmul.f32 %v1611_v33, %v1609_v2  ;;  %v2926_v29 = vld [vmem:[#allocation4 + $0x10] sm:$0xff] }
 0x19d   :  { %v1619_v18 = vmul.f32 %v1618_v59, %v1609_v2  ;;  %v2726_v17 = vsel %vm2719_vm7, %v2722_v12, %v2725_v7  ;;  %v2885_v5 = vmul.f32 %v2107_v1, %v4891_v42  ;;  %vm1627_vm14 = vcmp.eq.s32.totalorder %v4604_v6, 0 }
 0x19e   :  { %v1640_v58 = vmul.f32 %v4596_v63, %v4903_v39  ;;  %v1641_v19 = vmul.f32 %v4602_v41, %v4904_v35  ;;  %v2727_v3 = vsel %vm1470_vm1, nan, %v2726_v17  ;;  %vm2875_vm15 = vcmp.eq.s32.totalorder %v4697_v52, 0 }
 0x19f   :  { %v1613_v16 = vadd.f32 -0.4999988, %v1612_v30  ;;  %v1620_v22 = vadd.f32 -0.16666654, %v1619_v18  ;;  %vm1626_vm8 = vcmp.lt.s32.totalorder %v4604_v6, 2  ;;  %vm2874_vm0 = vcmp.lt.s32.totalorder %v4697_v52, 2 }
 0x1a0   :  { %v2886_v25 = vmul.f32 %v2262_v54, %v4892_v8  ;;  %v2887_v42 = vmul.f32 %v2417_v14, %v4893_v49  ;;  %v2888_v63 = vmul.f32 %v2572_v34, %v4903_v39  ;;  %v2889_v36 = vmul.f32 %v2727_v3, %v4904_v35  ;;  %v2931_v18 = vld [vmem:[#allocation4 + $0x38] sm:$0xff] }
 0x1a1   :  { %v2899_v41 = vrot.slane %v4655_v53, 4  ;;  %v2900_v27 = vrot.slane %v2884_v45, 4  ;;  %v1614_v60 = vmul.f32 %v1613_v16, %v1609_v2  ;;  %v1621_v47 = vmul.f32 %v1620_v22, %v1609_v2  ;;  %v2927_v53 = vld [vmem:[#allocation4 + $0x18] sm:$0xff] }
 0x1a2   :  { %v2901_v44 = vrot.slane %v2885_v5, 4  ;;  %v2902_v9 = vrot.slane %v2886_v25, 4  ;;  %v2903_v15 = vrot.slane %v2887_v42, 4  ;;  %v2904_v1 = vrot.slane %v2888_v63, 4 }
 0x1a3   :  { %v2905_v55 = vrot.slane %v2889_v36, 4  ;;  %vm2915_vm1 = vcmask 1043456   ;;  %v1615_v24 = vadd.f32 1.0, %v1614_v60  ;;  %v1622_v8 = vadd.f32 1.0, %v1621_v47 }
 0x1a4   :  { %v2916_v49 = vsel %vm2915_vm1, %v4617_v51, %v2899_v41  ;;  %v2917_v61 = vsel %vm2915_vm1, %v4621_v32, %v2900_v27  ;;  %vm2878_vm12 = vcmp.eq.s32.totalorder %v4697_v52, 2  ;;  %v2918_v43 = vsel %vm2915_vm1, %v4625_v26, %v2901_v44 }
 0x1a5   :  { %v2919_v50 = vsel %vm2915_vm1, %v4629_v56, %v2902_v9  ;;  %v2920_v57 = vsel %vm2915_vm1, %v4632_v31, %v2903_v15  ;;  %v1623_v51 = vmul.f32 %v1622_v8, %v4668_v13  ;;  %v1631_v37 = vxor.u32 2147483648, %v1615_v24  ;;  %v4905_v13 = vld [vmem:[#allocation26_spill] sm:$0xff] }
 0x1a6   :  { %v2921_v32 = vsel %vm2915_vm1, %v1640_v58, %v2904_v1  ;;  %v2932_v2 = vadd.f32 %v2924_v23, %v2916_v49  ;;  %v2922_v54 = vsel %vm2915_vm1, %v1641_v19, %v2905_v55  ;;  %v2933_v0 = vadd.f32 %v2925_v38, %v2917_v61 }
 0x1a7   :  { %v2934_v4 = vadd.f32 %v2926_v29, %v2918_v43  ;;  %v2935_v26 = vadd.f32 %v2927_v53, %v2919_v50  ;;  %v1628_v10 = vxor.u32 2147483648, %v1623_v51  ;;  %v1632_v56 = vsel %vm1630_vm10, %v1631_v37, %v1623_v51 }
 0x1a8   :  { %v2880_v31 = vsel %vm2878_vm12, %v1631_v37, %v1623_v51  ;;  %v2936_v28 = vadd.f32 %v2928_v11, %v2920_v57  ;;  %2940 = vst [vmem:[#allocation7] sm:$0xff] %v2932_v2  ;;  %v394_v14 = vmul.f32 0.1, %v4905_v13  ;;  %vm1624_vm2 = vweird.f32 %v4863_v62 }
 0x1a9   :  { %v2937_v40 = vadd.f32 %v2929_v48, %v2921_v32  ;;  %2941 = vst [vmem:[#allocation7 + $0x8] sm:$0xff] %v2933_v0  ;;  %v1629_v46 = vsel %vm1627_vm14, %v1615_v24, %v1628_v10  ;;  %v2877_v33 = vsel %vm2875_vm15, %v1615_v24, %v1628_v10  ;;  %v2938_v59 = vadd.f32 %v2930_v21, %v2922_v54 }
 0x1aa   :  { %2942 = vst [vmem:[#allocation7 + $0x10] sm:$0xff] %v2934_v4  ;;  %v1633_v20 = vsel %vm1626_vm8, %v1629_v46, %v1632_v56  ;;  %v2881_v12 = vsel %vm2874_vm0, %v2877_v33, %v2880_v31 }
 0x1ab   :  { %2943 = vst [vmem:[#allocation7 + $0x18] sm:$0xff] %v2935_v26  ;;  %v1634_v34 = vsel %vm1624_vm2, nan, %v1633_v20  ;;  %v2882_v7 = vsel %vm1624_vm2, nan, %v2881_v12 }
 0x1ac   :  { %2944 = vst [vmem:[#allocation7 + $0x20] sm:$0xff] %v2936_v28  ;;  %v1642_v62 = vmul.f32 %v1634_v34, %v394_v14  ;;  %v2890_v45 = vmul.f32 %v2882_v7, %v394_v14 }
 0x1ad   :  { %2945 = vst [vmem:[#allocation7 + $0x28] sm:$0xff] %v2937_v40 }
 0x1ae   :  { %2946 = vst [vmem:[#allocation7 + $0x30] sm:$0xff] %v2938_v59  ;;  %v2906_v30 = vrot.slane %v2890_v45, 4 }
 0x1b0   :  { %v2923_v6 = vsel %vm2915_vm1, %v1642_v62, %v2906_v30 }
 0x1b1   :  { %v2939_v52 = vadd.f32 %v2931_v18, %v2923_v6 }
 0x1b3   :  { %2947 = vst [vmem:[#allocation7 + $0x38] sm:$0xff] %v2939_v52 }
 0x1b4   :  { %2958 = dma.vmem_to_hbm [thread:$0]  %s2954_s1, 1024, %s2956_s19, [#allocation6]  }
 0x1b5   :  { %3120 = dma.done.wait [#allocation6], 1024  }
 0x1b6   :  { %3121 = vsyncadd [#allocation6], 4294966272 }
 0x1b7   :  { %2963 = vsyncpa [#allocation5], 1 }
 0x1b8   :  { %2964 = vsyncpa [#allocation6], 1 }

</bundles_post_ra>
